<compile_context>
chip_gen: v7x
topology: tpu7x:2x2x1
jax: 0.10.0
libtpu: 0.0.40
codegen_flags: <defaults>
</compile_context>

<pallas_src>
import numpy as np
import jax
import jax.numpy as jnp
from jax.experimental import pallas as pl
from jax.experimental.pallas import tpu as pltpu


# -------------------------- static selection matrices ------------------------
def _make_pool_subsample(lm, wp, h_out, w_out):
    # picks column 2*i*wp + 2*j  ->  output i*w_out + j   (stride-2 subsample)
    m = np.zeros((lm, h_out * w_out), np.float32)
    for i in range(h_out):
        for j in range(w_out):
            m[2 * i * wp + 2 * j, i * w_out + j] = 1.0
    return m


def _make_crop(length, w_in, h_out, w_out):
    # picks column r*w_in + c  ->  output r*w_out + c      (drop wrap columns)
    m = np.zeros((length, h_out * w_out), np.float32)
    for r in range(h_out):
        for c in range(w_out):
            m[r * w_in + c, r * w_out + c] = 1.0
    return m


# --------------------------------- kernel ------------------------------------
def _make_kernel(bt, wp, lm1, wpool, l2, l3):
    f32 = jnp.float32
    bf16 = jnp.bfloat16

    def kernel(x_ref, w1_ref, b1_ref, w2_ref, b2_ref, w3_ref, b3_ref,
               wh_ref, bh_ref, s1_ref, s3_ref, alpha_ref, out_ref):
        w1 = w1_ref[...]
        w2 = w2_ref[...]
        w3 = w3_ref[...]
        wh = wh_ref[...]
        b1 = b1_ref[...]
        b2 = b2_ref[...]
        b3 = b3_ref[...]
        bh = bh_ref[...]
        s1 = s1_ref[...]
        s3 = s3_ref[...]
        a1 = alpha_ref[0]          # PReLU shared scalars (SMEM)
        a2 = alpha_ref[1]
        a3 = alpha_ref[2]

        for b in range(bt):                                  # samples per step
            xc = x_ref[b]                                    # [27, LF1] bf16
            # conv1 (3x3, pad=1): taps pre-stacked along K=27 -> one matmul
            h1 = jnp.dot(w1, xc, preferred_element_type=f32) + b1
            h1 = jnp.where(h1 >= 0.0, h1, a1 * h1)           # PReLU

            # maxpool1 (3x3, stride 2, floor): running 3x3 max on the VPU via
            # 9 lane-shifted slices, then one 0/1 stride-2 subsample matmul.
            m = h1[:, 0:lm1]
            for ph in range(3):
                for pw in range(3):
                    if ph == 0 and pw == 0:
                        continue
                    off = ph * wp + pw
                    m = jnp.maximum(m, h1[:, off:off + lm1])
            p1 = jnp.dot(m.astype(bf16), s1, preferred_element_type=f32)

            # conv2 (3x3, valid): stack the 9 taps along K=90, one matmul
            c2 = jnp.concatenate(
                [p1[:, (kh * wpool + kw):(kh * wpool + kw) + l2]
                 for kh in range(3) for kw in range(3)], axis=0)
            h2 = jnp.dot(w2, c2.astype(bf16), preferred_element_type=f32) + b2
            h2 = jnp.where(h2 >= 0.0, h2, a2 * h2)           # PReLU

            # conv3 (3x3, valid): stack taps along K=144, one matmul
            c3 = jnp.concatenate(
                [h2[:, (kh * wpool + kw):(kh * wpool + kw) + l3]
                 for kh in range(3) for kw in range(3)], axis=0)
            h3 = jnp.dot(w3, c3.astype(bf16), preferred_element_type=f32) + b3
            h3 = jnp.where(h3 >= 0.0, h3, a3 * h3)           # PReLU

            # crop the valid spatial columns, then all three 1x1 heads fused
            h3c = jnp.dot(h3.astype(bf16), s3, preferred_element_type=f32)
            z = jnp.dot(wh, h3c.astype(bf16), preferred_element_type=f32) + bh
            row = jax.lax.broadcasted_iota(jnp.int32, z.shape, 0)
            out = jnp.where(row == 0, 1.0 / (1.0 + jnp.exp(-z)), z)  # sigmoid on conf row
            out_ref[b] = out

    return kernel


# --------------------------- parameters (synthetic) ---------------------------
def init_params(key):
    ks = jax.random.split(key, 12)

    def nrm(k, shape, fan_in):
        return jax.random.normal(k, shape, jnp.float32) / np.sqrt(float(fan_in))

    p = {}
    p['w1'] = nrm(ks[0], (10, 3, 3, 3), 3 * 9)
    p['b1'] = nrm(ks[1], (10,), 3 * 9)
    p['w2'] = nrm(ks[2], (16, 10, 3, 3), 10 * 9)
    p['b2'] = nrm(ks[3], (16,), 10 * 9)
    p['w3'] = nrm(ks[4], (32, 16, 3, 3), 16 * 9)
    p['b3'] = nrm(ks[5], (32,), 16 * 9)
    p['w4_1'] = nrm(ks[6], (1, 32, 1, 1), 32)
    p['b4_1'] = nrm(ks[7], (1,), 32)
    p['w4_2'] = nrm(ks[8], (4, 32, 1, 1), 32)
    p['b4_2'] = nrm(ks[9], (4,), 32)
    p['w4_3'] = nrm(ks[10], (10, 32, 1, 1), 32)
    p['b4_3'] = nrm(ks[11], (10,), 32)
    # nn.PReLU() default: one shared parameter per module, init 0.25 (3 modules)
    p['alpha'] = jnp.full((3,), 0.25, jnp.float32)
    return p


# ---------------------------------- forward -----------------------------------
def p_net_forward(x, p, block_b=8):
    f32 = jnp.float32
    bf16 = jnp.bfloat16
    B, cin, H, W = x.shape
    assert cin == 3

    # static geometry (P_Net is fully convolutional)
    Hp, Wp = H + 2, W + 2                       # conv1 padded grid
    Hpool = (H - 3) // 2 + 1                    # MaxPool2d(3, 2), floor mode
    Wpool = (W - 3) // 2 + 1
    H2, W2 = Hpool - 2, Wpool - 2               # conv2 (valid)
    H3, W3 = H2 - 2, W2 - 2                     # conv3 (valid)
    assert H3 >= 1 and W3 >= 1, "input too small for P_Net"

    LM1 = 2 * (Hpool - 1) * Wp + 2 * (Wpool - 1) + 1   # pool base positions
    LF1 = LM1 + 2 * Wp + 2                             # conv1 output columns
    L3 = (H3 - 1) * Wpool + W3                         # conv3 output columns
    L2 = L3 + 2 * Wpool + 2                            # conv2 output columns
    NS = H3 * W3

    # ---- batch blocking (amortize per-grid-step overhead) ----
    Bt = min(block_b, B)
    nb = -(-B // Bt)
    Bp = nb * Bt
    if Bp != B:
        x = jnp.pad(x, ((0, Bp - B), (0, 0), (0, 0), (0, 0)))

    # ---- glue: zero-pad, flatten, and stack conv1 taps along K=27 ----
    need_cols = LF1 + 2 * Wp + 2
    extra_rows = max(0, -(-(need_cols - Hp * Wp) // Wp))
    xpad = jnp.pad(x, ((0, 0), (0, 0), (1, 1 + extra_rows), (1, 1)))
    xf = xpad.reshape(Bp, 3, (Hp + extra_rows) * Wp)
    x_cat = jnp.concatenate(
        [xf[:, :, (kh * Wp + kw):(kh * Wp + kw) + LF1]
         for kh in range(3) for kw in range(3)], axis=1).astype(bf16)

    # ---- weights: [Cout, Cin*k*k] with taps along K, cast to bf16 ----
    w1 = jnp.transpose(p['w1'], (0, 2, 3, 1)).reshape(10, 27).astype(bf16)
    w2 = jnp.transpose(p['w2'], (0, 2, 3, 1)).reshape(16, 90).astype(bf16)
    w3 = jnp.transpose(p['w3'], (0, 2, 3, 1)).reshape(32, 144).astype(bf16)
    b1 = p['b1'].reshape(10, 1).astype(f32)
    b2 = p['b2'].reshape(16, 1).astype(f32)
    b3 = p['b3'].reshape(32, 1).astype(f32)

    # fused 1x1-conv heads: conf(1) + face(4) + facial(10) = 15 channels
    wh = jnp.concatenate([p['w4_1'].reshape(1, 32),
                          p['w4_2'].reshape(4, 32),
                          p['w4_3'].reshape(10, 32)], axis=0).astype(bf16)
    bh = jnp.concatenate([p['b4_1'], p['b4_2'], p['b4_3']]).reshape(15, 1).astype(f32)

    s1 = jnp.asarray(_make_pool_subsample(LM1, Wp, Hpool, Wpool)).astype(bf16)
    s3 = jnp.asarray(_make_crop(L3, Wpool, H3, W3)).astype(bf16)
    alpha = p['alpha'].astype(f32)

    kernel = _make_kernel(Bt, Wp, LM1, Wpool, L2, L3)

    out = pl.pallas_call(
        kernel,
        out_shape=jax.ShapeDtypeStruct((Bp, 15, NS), f32),
        grid=(nb,),
        in_specs=[
            pl.BlockSpec((Bt, 27, LF1), lambda i: (i, 0, 0)),
            pl.BlockSpec((10, 27), lambda i: (0, 0)),
            pl.BlockSpec((10, 1), lambda i: (0, 0)),
            pl.BlockSpec((16, 90), lambda i: (0, 0)),
            pl.BlockSpec((16, 1), lambda i: (0, 0)),
            pl.BlockSpec((32, 144), lambda i: (0, 0)),
            pl.BlockSpec((32, 1), lambda i: (0, 0)),
            pl.BlockSpec((15, 32), lambda i: (0, 0)),
            pl.BlockSpec((15, 1), lambda i: (0, 0)),
            pl.BlockSpec((LM1, Hpool * Wpool), lambda i: (0, 0)),
            pl.BlockSpec((L3, NS), lambda i: (0, 0)),
            pl.BlockSpec(memory_space=pltpu.MemorySpace.SMEM),   # PReLU alphas
        ],
        out_specs=pl.BlockSpec((Bt, 15, NS), lambda i: (i, 0, 0)),
        compiler_params=pltpu.CompilerParams(
            dimension_semantics=("parallel",)),
    )(x_cat, w1, b1, w2, b2, w3, b3, wh, bh, s1, s3, alpha)

    # glue: split fused head channels and restore NCHW feature-map shapes
    out = out[:B].reshape(B, 15, H3, W3)
    cond = out[:, 0:1]
    offset_face = out[:, 1:5]
    offset_facial = out[:, 5:15]
    return cond, offset_face, offset_facial


# ------------------------------------ main ------------------------------------
if __name__ == "__main__":
    key = jax.random.PRNGKey(0)
    pkey, xkey = jax.random.split(key)
    params = init_params(pkey)

    # P-Net is fully convolutional; use small 16x16 RGB crops: NCHW [B, 3, 16, 16]
    x = jax.random.normal(xkey, (2, 3, 16, 16), jnp.float32)

    cond, off_face, off_facial = jax.jit(p_net_forward)(x, params)
    jax.block_until_ready((cond, off_face, off_facial))

    assert cond.shape == (2, 1, 3, 3)
    assert off_face.shape == (2, 4, 3, 3)
    assert off_facial.shape == (2, 10, 3, 3)
    assert bool(jnp.all(jnp.isfinite(cond)))
    assert bool(jnp.all((cond > 0.0) & (cond < 1.0)))
    assert bool(jnp.all(jnp.isfinite(off_face)))
    assert bool(jnp.all(jnp.isfinite(off_facial)))

    print("KERNEL_OK")
</pallas_src>

<mosaic_0001>
module attributes {stable_mosaic.version = 11 : i64} {
  func.func @kernel(%arg0: i32, %arg1: memref<2x27x267xbf16, #tpu.memory_space<vmem>>, %arg2: memref<10x27xbf16, #tpu.memory_space<vmem>>, %arg3: memref<10x1xf32, #tpu.memory_space<vmem>>, %arg4: memref<16x90xbf16, #tpu.memory_space<vmem>>, %arg5: memref<16x1xf32, #tpu.memory_space<vmem>>, %arg6: memref<32x144xbf16, #tpu.memory_space<vmem>>, %arg7: memref<32x1xf32, #tpu.memory_space<vmem>>, %arg8: memref<15x32xbf16, #tpu.memory_space<vmem>>, %arg9: memref<15x1xf32, #tpu.memory_space<vmem>>, %arg10: memref<229x49xbf16, #tpu.memory_space<vmem>>, %arg11: memref<17x9xbf16, #tpu.memory_space<vmem>>, %arg12: memref<3xf32, #tpu.memory_space<smem>>, %arg13: memref<2x15x9xf32, #tpu.memory_space<vmem>>) attributes {dimension_semantics = [#tpu.dimension_semantics<parallel>], iteration_bounds = array<i64: 1>, scalar_prefetch = 0 : i64, scratch_operands = 0 : i64, tpu.core_type = #tpu.core_type<tc>, window_params = [{transform_indices = @transform_0, window_bounds = array<i64: 2, 27, 267>}, {pipeline_mode = #tpu.pipeline_mode<synchronous>, transform_indices = @transform_1, window_bounds = array<i64: 10, 27>}, {pipeline_mode = #tpu.pipeline_mode<synchronous>, transform_indices = @transform_2, window_bounds = array<i64: 10, 1>}, {pipeline_mode = #tpu.pipeline_mode<synchronous>, transform_indices = @transform_3, window_bounds = array<i64: 16, 90>}, {pipeline_mode = #tpu.pipeline_mode<synchronous>, transform_indices = @transform_4, window_bounds = array<i64: 16, 1>}, {pipeline_mode = #tpu.pipeline_mode<synchronous>, transform_indices = @transform_5, window_bounds = array<i64: 32, 144>}, {pipeline_mode = #tpu.pipeline_mode<synchronous>, transform_indices = @transform_6, window_bounds = array<i64: 32, 1>}, {pipeline_mode = #tpu.pipeline_mode<synchronous>, transform_indices = @transform_7, window_bounds = array<i64: 15, 32>}, {pipeline_mode = #tpu.pipeline_mode<synchronous>, transform_indices = @transform_8, window_bounds = array<i64: 15, 1>}, {pipeline_mode = #tpu.pipeline_mode<synchronous>, transform_indices = @transform_9, window_bounds = array<i64: 229, 49>}, {pipeline_mode = #tpu.pipeline_mode<synchronous>, transform_indices = @transform_10, window_bounds = array<i64: 17, 9>}, {transform_indices = @transform_11, window_bounds = array<i64: 3>}, {transform_indices = @transform_12, window_bounds = array<i64: 2, 15, 9>}]} {
    %c0 = arith.constant 0 : index
    %c0_0 = arith.constant 0 : index
    %0 = vector.load %arg2[%c0, %c0_0] : memref<10x27xbf16, #tpu.memory_space<vmem>>, vector<10x27xbf16>
    %c0_1 = arith.constant 0 : index
    %c0_2 = arith.constant 0 : index
    %1 = vector.load %arg4[%c0_1, %c0_2] : memref<16x90xbf16, #tpu.memory_space<vmem>>, vector<16x90xbf16>
    %c0_3 = arith.constant 0 : index
    %c0_4 = arith.constant 0 : index
    %2 = vector.load %arg6[%c0_3, %c0_4] : memref<32x144xbf16, #tpu.memory_space<vmem>>, vector<32x144xbf16>
    %c0_5 = arith.constant 0 : index
    %c0_6 = arith.constant 0 : index
    %3 = vector.load %arg8[%c0_5, %c0_6] : memref<15x32xbf16, #tpu.memory_space<vmem>>, vector<15x32xbf16>
    %c0_7 = arith.constant 0 : index
    %c0_8 = arith.constant 0 : index
    %4 = vector.load %arg3[%c0_7, %c0_8] : memref<10x1xf32, #tpu.memory_space<vmem>>, vector<10x1xf32>
    %c0_9 = arith.constant 0 : index
    %c0_10 = arith.constant 0 : index
    %5 = vector.load %arg5[%c0_9, %c0_10] : memref<16x1xf32, #tpu.memory_space<vmem>>, vector<16x1xf32>
    %c0_11 = arith.constant 0 : index
    %c0_12 = arith.constant 0 : index
    %6 = vector.load %arg7[%c0_11, %c0_12] : memref<32x1xf32, #tpu.memory_space<vmem>>, vector<32x1xf32>
    %c0_13 = arith.constant 0 : index
    %c0_14 = arith.constant 0 : index
    %7 = vector.load %arg9[%c0_13, %c0_14] : memref<15x1xf32, #tpu.memory_space<vmem>>, vector<15x1xf32>
    %c0_15 = arith.constant 0 : index
    %c0_16 = arith.constant 0 : index
    %8 = vector.load %arg10[%c0_15, %c0_16] : memref<229x49xbf16, #tpu.memory_space<vmem>>, vector<229x49xbf16>
    %c0_17 = arith.constant 0 : index
    %c0_18 = arith.constant 0 : index
    %9 = vector.load %arg11[%c0_17, %c0_18] : memref<17x9xbf16, #tpu.memory_space<vmem>>, vector<17x9xbf16>
    %c0_19 = arith.constant 0 : index
    %10 = memref.load %arg12[%c0_19] : memref<3xf32, #tpu.memory_space<smem>>
    %c1 = arith.constant 1 : index
    %11 = memref.load %arg12[%c1] : memref<3xf32, #tpu.memory_space<smem>>
    %c2 = arith.constant 2 : index
    %12 = memref.load %arg12[%c2] : memref<3xf32, #tpu.memory_space<smem>>
    %c0_20 = arith.constant 0 : index
    %c0_21 = arith.constant 0 : index
    %c0_22 = arith.constant 0 : index
    %13 = vector.load %arg1[%c0_20, %c0_21, %c0_22] : memref<2x27x267xbf16, #tpu.memory_space<vmem>>, vector<1x27x267xbf16>
    %14 = vector.shape_cast %13 : vector<1x27x267xbf16> to vector<27x267xbf16>
    %cst = arith.constant dense<0.000000e+00> : vector<10x267xf32>
    %15 = tpu.matmul %0, %14, %cst {dimension_numbers = #tpu.dot_dimension_numbers<[1], [0], [0], [1], [0, 0, 1, 1], [], []>} : vector<10x27xbf16>, vector<27x267xbf16>, vector<10x267xf32> -> vector<10x267xf32>
    %16 = vector.broadcast %4 : vector<10x1xf32> to vector<10x267xf32>
    %17 = arith.addf %15, %16 : vector<10x267xf32>
    %cst_23 = arith.constant 0.000000e+00 : f32
    %18 = vector.broadcast %cst_23 : f32 to vector<10x267xf32>
    %19 = arith.cmpf oge, %17, %18 : vector<10x267xf32>
    %20 = vector.broadcast %10 : f32 to vector<10x267xf32>
    %21 = arith.mulf %20, %17 : vector<10x267xf32>
    %22 = arith.select %19, %17, %21 : vector<10x267xi1>, vector<10x267xf32>
    %23 = vector.extract_strided_slice %22 {offsets = [0, 0], sizes = [10, 229], strides = [1, 1]} : vector<10x267xf32> to vector<10x229xf32>
    %24 = vector.extract_strided_slice %22 {offsets = [0, 1], sizes = [10, 229], strides = [1, 1]} : vector<10x267xf32> to vector<10x229xf32>
    %25 = arith.maximumf %23, %24 : vector<10x229xf32>
    %26 = vector.extract_strided_slice %22 {offsets = [0, 2], sizes = [10, 229], strides = [1, 1]} : vector<10x267xf32> to vector<10x229xf32>
    %27 = arith.maximumf %25, %26 : vector<10x229xf32>
    %28 = vector.extract_strided_slice %22 {offsets = [0, 18], sizes = [10, 229], strides = [1, 1]} : vector<10x267xf32> to vector<10x229xf32>
    %29 = arith.maximumf %27, %28 : vector<10x229xf32>
    %30 = vector.extract_strided_slice %22 {offsets = [0, 19], sizes = [10, 229], strides = [1, 1]} : vector<10x267xf32> to vector<10x229xf32>
    %31 = arith.maximumf %29, %30 : vector<10x229xf32>
    %32 = vector.extract_strided_slice %22 {offsets = [0, 20], sizes = [10, 229], strides = [1, 1]} : vector<10x267xf32> to vector<10x229xf32>
    %33 = arith.maximumf %31, %32 : vector<10x229xf32>
    %34 = vector.extract_strided_slice %22 {offsets = [0, 36], sizes = [10, 229], strides = [1, 1]} : vector<10x267xf32> to vector<10x229xf32>
    %35 = arith.maximumf %33, %34 : vector<10x229xf32>
    %36 = vector.extract_strided_slice %22 {offsets = [0, 37], sizes = [10, 229], strides = [1, 1]} : vector<10x267xf32> to vector<10x229xf32>
    %37 = arith.maximumf %35, %36 : vector<10x229xf32>
    %38 = vector.extract_strided_slice %22 {offsets = [0, 38], sizes = [10, 229], strides = [1, 1]} : vector<10x267xf32> to vector<10x229xf32>
    %39 = arith.maximumf %37, %38 : vector<10x229xf32>
    %40 = arith.truncf %39 : vector<10x229xf32> to vector<10x229xbf16>
    %cst_24 = arith.constant dense<0.000000e+00> : vector<10x49xf32>
    %41 = tpu.matmul %40, %8, %cst_24 {dimension_numbers = #tpu.dot_dimension_numbers<[1], [0], [0], [1], [0, 0, 1, 1], [], []>} : vector<10x229xbf16>, vector<229x49xbf16>, vector<10x49xf32> -> vector<10x49xf32>
    %42 = vector.extract_strided_slice %41 {offsets = [0, 0], sizes = [10, 33], strides = [1, 1]} : vector<10x49xf32> to vector<10x33xf32>
    %43 = vector.extract_strided_slice %41 {offsets = [0, 1], sizes = [10, 33], strides = [1, 1]} : vector<10x49xf32> to vector<10x33xf32>
    %44 = vector.extract_strided_slice %41 {offsets = [0, 2], sizes = [10, 33], strides = [1, 1]} : vector<10x49xf32> to vector<10x33xf32>
    %45 = vector.extract_strided_slice %41 {offsets = [0, 7], sizes = [10, 33], strides = [1, 1]} : vector<10x49xf32> to vector<10x33xf32>
    %46 = vector.extract_strided_slice %41 {offsets = [0, 8], sizes = [10, 33], strides = [1, 1]} : vector<10x49xf32> to vector<10x33xf32>
    %47 = vector.extract_strided_slice %41 {offsets = [0, 9], sizes = [10, 33], strides = [1, 1]} : vector<10x49xf32> to vector<10x33xf32>
    %48 = vector.extract_strided_slice %41 {offsets = [0, 14], sizes = [10, 33], strides = [1, 1]} : vector<10x49xf32> to vector<10x33xf32>
    %49 = vector.extract_strided_slice %41 {offsets = [0, 15], sizes = [10, 33], strides = [1, 1]} : vector<10x49xf32> to vector<10x33xf32>
    %50 = vector.extract_strided_slice %41 {offsets = [0, 16], sizes = [10, 33], strides = [1, 1]} : vector<10x49xf32> to vector<10x33xf32>
    %51 = tpu.concatenate %42, %43, %44, %45, %46, %47, %48, %49, %50 in 0 : vector<10x33xf32>, vector<10x33xf32>, vector<10x33xf32>, vector<10x33xf32>, vector<10x33xf32>, vector<10x33xf32>, vector<10x33xf32>, vector<10x33xf32>, vector<10x33xf32> -> vector<90x33xf32>
    %52 = arith.truncf %51 : vector<90x33xf32> to vector<90x33xbf16>
    %cst_25 = arith.constant dense<0.000000e+00> : vector<16x33xf32>
    %53 = tpu.matmul %1, %52, %cst_25 {dimension_numbers = #tpu.dot_dimension_numbers<[1], [0], [0], [1], [0, 0, 1, 1], [], []>} : vector<16x90xbf16>, vector<90x33xbf16>, vector<16x33xf32> -> vector<16x33xf32>
    %54 = vector.broadcast %5 : vector<16x1xf32> to vector<16x33xf32>
    %55 = arith.addf %53, %54 : vector<16x33xf32>
    %cst_26 = arith.constant 0.000000e+00 : f32
    %56 = vector.broadcast %cst_26 : f32 to vector<16x33xf32>
    %57 = arith.cmpf oge, %55, %56 : vector<16x33xf32>
    %58 = vector.broadcast %11 : f32 to vector<16x33xf32>
    %59 = arith.mulf %58, %55 : vector<16x33xf32>
    %60 = arith.select %57, %55, %59 : vector<16x33xi1>, vector<16x33xf32>
    %61 = vector.extract_strided_slice %60 {offsets = [0, 0], sizes = [16, 17], strides = [1, 1]} : vector<16x33xf32> to vector<16x17xf32>
    %62 = vector.extract_strided_slice %60 {offsets = [0, 1], sizes = [16, 17], strides = [1, 1]} : vector<16x33xf32> to vector<16x17xf32>
    %63 = vector.extract_strided_slice %60 {offsets = [0, 2], sizes = [16, 17], strides = [1, 1]} : vector<16x33xf32> to vector<16x17xf32>
    %64 = vector.extract_strided_slice %60 {offsets = [0, 7], sizes = [16, 17], strides = [1, 1]} : vector<16x33xf32> to vector<16x17xf32>
    %65 = vector.extract_strided_slice %60 {offsets = [0, 8], sizes = [16, 17], strides = [1, 1]} : vector<16x33xf32> to vector<16x17xf32>
    %66 = vector.extract_strided_slice %60 {offsets = [0, 9], sizes = [16, 17], strides = [1, 1]} : vector<16x33xf32> to vector<16x17xf32>
    %67 = vector.extract_strided_slice %60 {offsets = [0, 14], sizes = [16, 17], strides = [1, 1]} : vector<16x33xf32> to vector<16x17xf32>
    %68 = vector.extract_strided_slice %60 {offsets = [0, 15], sizes = [16, 17], strides = [1, 1]} : vector<16x33xf32> to vector<16x17xf32>
    %69 = vector.extract_strided_slice %60 {offsets = [0, 16], sizes = [16, 17], strides = [1, 1]} : vector<16x33xf32> to vector<16x17xf32>
    %70 = tpu.concatenate %61, %62, %63, %64, %65, %66, %67, %68, %69 in 0 : vector<16x17xf32>, vector<16x17xf32>, vector<16x17xf32>, vector<16x17xf32>, vector<16x17xf32>, vector<16x17xf32>, vector<16x17xf32>, vector<16x17xf32>, vector<16x17xf32> -> vector<144x17xf32>
    %71 = arith.truncf %70 : vector<144x17xf32> to vector<144x17xbf16>
    %cst_27 = arith.constant dense<0.000000e+00> : vector<32x17xf32>
    %72 = tpu.matmul %2, %71, %cst_27 {dimension_numbers = #tpu.dot_dimension_numbers<[1], [0], [0], [1], [0, 0, 1, 1], [], []>} : vector<32x144xbf16>, vector<144x17xbf16>, vector<32x17xf32> -> vector<32x17xf32>
    %73 = vector.broadcast %6 : vector<32x1xf32> to vector<32x17xf32>
    %74 = arith.addf %72, %73 : vector<32x17xf32>
    %cst_28 = arith.constant 0.000000e+00 : f32
    %75 = vector.broadcast %cst_28 : f32 to vector<32x17xf32>
    %76 = arith.cmpf oge, %74, %75 : vector<32x17xf32>
    %77 = vector.broadcast %12 : f32 to vector<32x17xf32>
    %78 = arith.mulf %77, %74 : vector<32x17xf32>
    %79 = arith.select %76, %74, %78 : vector<32x17xi1>, vector<32x17xf32>
    %80 = arith.truncf %79 : vector<32x17xf32> to vector<32x17xbf16>
    %cst_29 = arith.constant dense<0.000000e+00> : vector<32x9xf32>
    %81 = tpu.matmul %80, %9, %cst_29 {dimension_numbers = #tpu.dot_dimension_numbers<[1], [0], [0], [1], [0, 0, 1, 1], [], []>} : vector<32x17xbf16>, vector<17x9xbf16>, vector<32x9xf32> -> vector<32x9xf32>
    %82 = arith.truncf %81 : vector<32x9xf32> to vector<32x9xbf16>
    %cst_30 = arith.constant dense<0.000000e+00> : vector<15x9xf32>
    %83 = tpu.matmul %3, %82, %cst_30 {dimension_numbers = #tpu.dot_dimension_numbers<[1], [0], [0], [1], [0, 0, 1, 1], [], []>} : vector<15x32xbf16>, vector<32x9xbf16>, vector<15x9xf32> -> vector<15x9xf32>
    %84 = vector.broadcast %7 : vector<15x1xf32> to vector<15x9xf32>
    %85 = arith.addf %83, %84 : vector<15x9xf32>
    %86 = tpu.iota {dimensions = array<i32: 0>} : vector<15x9xi32>
    %c0_i32 = arith.constant 0 : i32
    %87 = vector.broadcast %c0_i32 : i32 to vector<15x9xi32>
    %88 = arith.cmpi eq, %86, %87 : vector<15x9xi32>
    %cst_31 = arith.constant 0.000000e+00 : f32
    %89 = vector.broadcast %cst_31 : f32 to vector<15x9xf32>
    %90 = arith.subf %89, %85 : vector<15x9xf32>
    %91 = math.exp %90 : vector<15x9xf32>
    %cst_32 = arith.constant 1.000000e+00 : f32
    %92 = vector.broadcast %cst_32 : f32 to vector<15x9xf32>
    %93 = arith.addf %92, %91 : vector<15x9xf32>
    %cst_33 = arith.constant 1.000000e+00 : f32
    %94 = vector.broadcast %cst_33 : f32 to vector<15x9xf32>
    %95 = arith.divf %94, %93 : vector<15x9xf32>
    %96 = arith.select %88, %95, %85 : vector<15x9xi1>, vector<15x9xf32>
    %c0_34 = arith.constant 0 : index
    %c0_35 = arith.constant 0 : index
    %c0_36 = arith.constant 0 : index
    %97 = vector.load %arg13[%c0_34, %c0_35, %c0_36] : memref<2x15x9xf32, #tpu.memory_space<vmem>>, vector<1x15x9xf32>
    %98 = vector.shape_cast %97 : vector<1x15x9xf32> to vector<15x9xf32>
    %99 = vector.shape_cast %96 : vector<15x9xf32> to vector<1x15x9xf32>
    tpu.vector_store %arg13[%c0_34, %c0_35, %c0_36], %99 {strides = array<i32>} : memref<2x15x9xf32, #tpu.memory_space<vmem>>, vector<1x15x9xf32>,
    %c1_37 = arith.constant 1 : index
    %c0_38 = arith.constant 0 : index
    %c0_39 = arith.constant 0 : index
    %100 = vector.load %arg1[%c1_37, %c0_38, %c0_39] : memref<2x27x267xbf16, #tpu.memory_space<vmem>>, vector<1x27x267xbf16>
    %101 = vector.shape_cast %100 : vector<1x27x267xbf16> to vector<27x267xbf16>
    %cst_40 = arith.constant dense<0.000000e+00> : vector<10x267xf32>
    %102 = tpu.matmul %0, %101, %cst_40 {dimension_numbers = #tpu.dot_dimension_numbers<[1], [0], [0], [1], [0, 0, 1, 1], [], []>} : vector<10x27xbf16>, vector<27x267xbf16>, vector<10x267xf32> -> vector<10x267xf32>
    %103 = vector.broadcast %4 : vector<10x1xf32> to vector<10x267xf32>
    %104 = arith.addf %102, %103 : vector<10x267xf32>
    %cst_41 = arith.constant 0.000000e+00 : f32
    %105 = vector.broadcast %cst_41 : f32 to vector<10x267xf32>
    %106 = arith.cmpf oge, %104, %105 : vector<10x267xf32>
    %107 = vector.broadcast %10 : f32 to vector<10x267xf32>
    %108 = arith.mulf %107, %104 : vector<10x267xf32>
    %109 = arith.select %106, %104, %108 : vector<10x267xi1>, vector<10x267xf32>
    %110 = vector.extract_strided_slice %109 {offsets = [0, 0], sizes = [10, 229], strides = [1, 1]} : vector<10x267xf32> to vector<10x229xf32>
    %111 = vector.extract_strided_slice %109 {offsets = [0, 1], sizes = [10, 229], strides = [1, 1]} : vector<10x267xf32> to vector<10x229xf32>
    %112 = arith.maximumf %110, %111 : vector<10x229xf32>
    %113 = vector.extract_strided_slice %109 {offsets = [0, 2], sizes = [10, 229], strides = [1, 1]} : vector<10x267xf32> to vector<10x229xf32>
    %114 = arith.maximumf %112, %113 : vector<10x229xf32>
    %115 = vector.extract_strided_slice %109 {offsets = [0, 18], sizes = [10, 229], strides = [1, 1]} : vector<10x267xf32> to vector<10x229xf32>
    %116 = arith.maximumf %114, %115 : vector<10x229xf32>
    %117 = vector.extract_strided_slice %109 {offsets = [0, 19], sizes = [10, 229], strides = [1, 1]} : vector<10x267xf32> to vector<10x229xf32>
    %118 = arith.maximumf %116, %117 : vector<10x229xf32>
    %119 = vector.extract_strided_slice %109 {offsets = [0, 20], sizes = [10, 229], strides = [1, 1]} : vector<10x267xf32> to vector<10x229xf32>
    %120 = arith.maximumf %118, %119 : vector<10x229xf32>
    %121 = vector.extract_strided_slice %109 {offsets = [0, 36], sizes = [10, 229], strides = [1, 1]} : vector<10x267xf32> to vector<10x229xf32>
    %122 = arith.maximumf %120, %121 : vector<10x229xf32>
    %123 = vector.extract_strided_slice %109 {offsets = [0, 37], sizes = [10, 229], strides = [1, 1]} : vector<10x267xf32> to vector<10x229xf32>
    %124 = arith.maximumf %122, %123 : vector<10x229xf32>
    %125 = vector.extract_strided_slice %109 {offsets = [0, 38], sizes = [10, 229], strides = [1, 1]} : vector<10x267xf32> to vector<10x229xf32>
    %126 = arith.maximumf %124, %125 : vector<10x229xf32>
    %127 = arith.truncf %126 : vector<10x229xf32> to vector<10x229xbf16>
    %cst_42 = arith.constant dense<0.000000e+00> : vector<10x49xf32>
    %128 = tpu.matmul %127, %8, %cst_42 {dimension_numbers = #tpu.dot_dimension_numbers<[1], [0], [0], [1], [0, 0, 1, 1], [], []>} : vector<10x229xbf16>, vector<229x49xbf16>, vector<10x49xf32> -> vector<10x49xf32>
    %129 = vector.extract_strided_slice %128 {offsets = [0, 0], sizes = [10, 33], strides = [1, 1]} : vector<10x49xf32> to vector<10x33xf32>
    %130 = vector.extract_strided_slice %128 {offsets = [0, 1], sizes = [10, 33], strides = [1, 1]} : vector<10x49xf32> to vector<10x33xf32>
    %131 = vector.extract_strided_slice %128 {offsets = [0, 2], sizes = [10, 33], strides = [1, 1]} : vector<10x49xf32> to vector<10x33xf32>
    %132 = vector.extract_strided_slice %128 {offsets = [0, 7], sizes = [10, 33], strides = [1, 1]} : vector<10x49xf32> to vector<10x33xf32>
    %133 = vector.extract_strided_slice %128 {offsets = [0, 8], sizes = [10, 33], strides = [1, 1]} : vector<10x49xf32> to vector<10x33xf32>
    %134 = vector.extract_strided_slice %128 {offsets = [0, 9], sizes = [10, 33], strides = [1, 1]} : vector<10x49xf32> to vector<10x33xf32>
    %135 = vector.extract_strided_slice %128 {offsets = [0, 14], sizes = [10, 33], strides = [1, 1]} : vector<10x49xf32> to vector<10x33xf32>
    %136 = vector.extract_strided_slice %128 {offsets = [0, 15], sizes = [10, 33], strides = [1, 1]} : vector<10x49xf32> to vector<10x33xf32>
    %137 = vector.extract_strided_slice %128 {offsets = [0, 16], sizes = [10, 33], strides = [1, 1]} : vector<10x49xf32> to vector<10x33xf32>
    %138 = tpu.concatenate %129, %130, %131, %132, %133, %134, %135, %136, %137 in 0 : vector<10x33xf32>, vector<10x33xf32>, vector<10x33xf32>, vector<10x33xf32>, vector<10x33xf32>, vector<10x33xf32>, vector<10x33xf32>, vector<10x33xf32>, vector<10x33xf32> -> vector<90x33xf32>
    %139 = arith.truncf %138 : vector<90x33xf32> to vector<90x33xbf16>
    %cst_43 = arith.constant dense<0.000000e+00> : vector<16x33xf32>
    %140 = tpu.matmul %1, %139, %cst_43 {dimension_numbers = #tpu.dot_dimension_numbers<[1], [0], [0], [1], [0, 0, 1, 1], [], []>} : vector<16x90xbf16>, vector<90x33xbf16>, vector<16x33xf32> -> vector<16x33xf32>
    %141 = vector.broadcast %5 : vector<16x1xf32> to vector<16x33xf32>
    %142 = arith.addf %140, %141 : vector<16x33xf32>
    %cst_44 = arith.constant 0.000000e+00 : f32
    %143 = vector.broadcast %cst_44 : f32 to vector<16x33xf32>
    %144 = arith.cmpf oge, %142, %143 : vector<16x33xf32>
    %145 = vector.broadcast %11 : f32 to vector<16x33xf32>
    %146 = arith.mulf %145, %142 : vector<16x33xf32>
    %147 = arith.select %144, %142, %146 : vector<16x33xi1>, vector<16x33xf32>
    %148 = vector.extract_strided_slice %147 {offsets = [0, 0], sizes = [16, 17], strides = [1, 1]} : vector<16x33xf32> to vector<16x17xf32>
    %149 = vector.extract_strided_slice %147 {offsets = [0, 1], sizes = [16, 17], strides = [1, 1]} : vector<16x33xf32> to vector<16x17xf32>
    %150 = vector.extract_strided_slice %147 {offsets = [0, 2], sizes = [16, 17], strides = [1, 1]} : vector<16x33xf32> to vector<16x17xf32>
    %151 = vector.extract_strided_slice %147 {offsets = [0, 7], sizes = [16, 17], strides = [1, 1]} : vector<16x33xf32> to vector<16x17xf32>
    %152 = vector.extract_strided_slice %147 {offsets = [0, 8], sizes = [16, 17], strides = [1, 1]} : vector<16x33xf32> to vector<16x17xf32>
    %153 = vector.extract_strided_slice %147 {offsets = [0, 9], sizes = [16, 17], strides = [1, 1]} : vector<16x33xf32> to vector<16x17xf32>
    %154 = vector.extract_strided_slice %147 {offsets = [0, 14], sizes = [16, 17], strides = [1, 1]} : vector<16x33xf32> to vector<16x17xf32>
    %155 = vector.extract_strided_slice %147 {offsets = [0, 15], sizes = [16, 17], strides = [1, 1]} : vector<16x33xf32> to vector<16x17xf32>
    %156 = vector.extract_strided_slice %147 {offsets = [0, 16], sizes = [16, 17], strides = [1, 1]} : vector<16x33xf32> to vector<16x17xf32>
    %157 = tpu.concatenate %148, %149, %150, %151, %152, %153, %154, %155, %156 in 0 : vector<16x17xf32>, vector<16x17xf32>, vector<16x17xf32>, vector<16x17xf32>, vector<16x17xf32>, vector<16x17xf32>, vector<16x17xf32>, vector<16x17xf32>, vector<16x17xf32> -> vector<144x17xf32>
    %158 = arith.truncf %157 : vector<144x17xf32> to vector<144x17xbf16>
    %cst_45 = arith.constant dense<0.000000e+00> : vector<32x17xf32>
    %159 = tpu.matmul %2, %158, %cst_45 {dimension_numbers = #tpu.dot_dimension_numbers<[1], [0], [0], [1], [0, 0, 1, 1], [], []>} : vector<32x144xbf16>, vector<144x17xbf16>, vector<32x17xf32> -> vector<32x17xf32>
    %160 = vector.broadcast %6 : vector<32x1xf32> to vector<32x17xf32>
    %161 = arith.addf %159, %160 : vector<32x17xf32>
    %cst_46 = arith.constant 0.000000e+00 : f32
    %162 = vector.broadcast %cst_46 : f32 to vector<32x17xf32>
    %163 = arith.cmpf oge, %161, %162 : vector<32x17xf32>
    %164 = vector.broadcast %12 : f32 to vector<32x17xf32>
    %165 = arith.mulf %164, %161 : vector<32x17xf32>
    %166 = arith.select %163, %161, %165 : vector<32x17xi1>, vector<32x17xf32>
    %167 = arith.truncf %166 : vector<32x17xf32> to vector<32x17xbf16>
    %cst_47 = arith.constant dense<0.000000e+00> : vector<32x9xf32>
    %168 = tpu.matmul %167, %9, %cst_47 {dimension_numbers = #tpu.dot_dimension_numbers<[1], [0], [0], [1], [0, 0, 1, 1], [], []>} : vector<32x17xbf16>, vector<17x9xbf16>, vector<32x9xf32> -> vector<32x9xf32>
    %169 = arith.truncf %168 : vector<32x9xf32> to vector<32x9xbf16>
    %cst_48 = arith.constant dense<0.000000e+00> : vector<15x9xf32>
    %170 = tpu.matmul %3, %169, %cst_48 {dimension_numbers = #tpu.dot_dimension_numbers<[1], [0], [0], [1], [0, 0, 1, 1], [], []>} : vector<15x32xbf16>, vector<32x9xbf16>, vector<15x9xf32> -> vector<15x9xf32>
    %171 = vector.broadcast %7 : vector<15x1xf32> to vector<15x9xf32>
    %172 = arith.addf %170, %171 : vector<15x9xf32>
    %173 = tpu.iota {dimensions = array<i32: 0>} : vector<15x9xi32>
    %c0_i32_49 = arith.constant 0 : i32
    %174 = vector.broadcast %c0_i32_49 : i32 to vector<15x9xi32>
    %175 = arith.cmpi eq, %173, %174 : vector<15x9xi32>
    %cst_50 = arith.constant 0.000000e+00 : f32
    %176 = vector.broadcast %cst_50 : f32 to vector<15x9xf32>
    %177 = arith.subf %176, %172 : vector<15x9xf32>
    %178 = math.exp %177 : vector<15x9xf32>
    %cst_51 = arith.constant 1.000000e+00 : f32
    %179 = vector.broadcast %cst_51 : f32 to vector<15x9xf32>
    %180 = arith.addf %179, %178 : vector<15x9xf32>
    %cst_52 = arith.constant 1.000000e+00 : f32
    %181 = vector.broadcast %cst_52 : f32 to vector<15x9xf32>
    %182 = arith.divf %181, %180 : vector<15x9xf32>
    %183 = arith.select %175, %182, %172 : vector<15x9xi1>, vector<15x9xf32>
    %c1_53 = arith.constant 1 : index
    %c0_54 = arith.constant 0 : index
    %c0_55 = arith.constant 0 : index
    %184 = vector.load %arg13[%c1_53, %c0_54, %c0_55] : memref<2x15x9xf32, #tpu.memory_space<vmem>>, vector<1x15x9xf32>
    %185 = vector.shape_cast %184 : vector<1x15x9xf32> to vector<15x9xf32>
    %186 = vector.shape_cast %183 : vector<15x9xf32> to vector<1x15x9xf32>
    tpu.vector_store %arg13[%c1_53, %c0_54, %c0_55], %186 {strides = array<i32>} : memref<2x15x9xf32, #tpu.memory_space<vmem>>, vector<1x15x9xf32>,
    return
  }
  func.func @transform_0(%arg0: i32) -> (i32, i32, i32) {
    %c0_i32 = arith.constant 0 : i32
    %c0_i32_0 = arith.constant 0 : i32
    %c0_i32_1 = arith.constant 0 : i32
    return %arg0, %c0_i32, %c0_i32_0 : i32, i32, i32
  }
  func.func @transform_1(%arg0: i32) -> (i32, i32) {
    %c0_i32 = arith.constant 0 : i32
    %c0_i32_0 = arith.constant 0 : i32
    %c0_i32_1 = arith.constant 0 : i32
    return %c0_i32, %c0_i32_0 : i32, i32
  }
  func.func @transform_2(%arg0: i32) -> (i32, i32) {
    %c0_i32 = arith.constant 0 : i32
    %c0_i32_0 = arith.constant 0 : i32
    %c0_i32_1 = arith.constant 0 : i32
    return %c0_i32, %c0_i32_0 : i32, i32
  }
  func.func @transform_3(%arg0: i32) -> (i32, i32) {
    %c0_i32 = arith.constant 0 : i32
    %c0_i32_0 = arith.constant 0 : i32
    %c0_i32_1 = arith.constant 0 : i32
    return %c0_i32, %c0_i32_0 : i32, i32
  }
  func.func @transform_4(%arg0: i32) -> (i32, i32) {
    %c0_i32 = arith.constant 0 : i32
    %c0_i32_0 = arith.constant 0 : i32
    %c0_i32_1 = arith.constant 0 : i32
    return %c0_i32, %c0_i32_0 : i32, i32
  }
  func.func @transform_5(%arg0: i32) -> (i32, i32) {
    %c0_i32 = arith.constant 0 : i32
    %c0_i32_0 = arith.constant 0 : i32
    %c0_i32_1 = arith.constant 0 : i32
    return %c0_i32, %c0_i32_0 : i32, i32
  }
  func.func @transform_6(%arg0: i32) -> (i32, i32) {
    %c0_i32 = arith.constant 0 : i32
    %c0_i32_0 = arith.constant 0 : i32
    %c0_i32_1 = arith.constant 0 : i32
    return %c0_i32, %c0_i32_0 : i32, i32
  }
  func.func @transform_7(%arg0: i32) -> (i32, i32) {
    %c0_i32 = arith.constant 0 : i32
    %c0_i32_0 = arith.constant 0 : i32
    %c0_i32_1 = arith.constant 0 : i32
    return %c0_i32, %c0_i32_0 : i32, i32
  }
  func.func @transform_8(%arg0: i32) -> (i32, i32) {
    %c0_i32 = arith.constant 0 : i32
    %c0_i32_0 = arith.constant 0 : i32
    %c0_i32_1 = arith.constant 0 : i32
    return %c0_i32, %c0_i32_0 : i32, i32
  }
  func.func @transform_9(%arg0: i32) -> (i32, i32) {
    %c0_i32 = arith.constant 0 : i32
    %c0_i32_0 = arith.constant 0 : i32
    %c0_i32_1 = arith.constant 0 : i32
    return %c0_i32, %c0_i32_0 : i32, i32
  }
  func.func @transform_10(%arg0: i32) -> (i32, i32) {
    %c0_i32 = arith.constant 0 : i32
    %c0_i32_0 = arith.constant 0 : i32
    %c0_i32_1 = arith.constant 0 : i32
    return %c0_i32, %c0_i32_0 : i32, i32
  }
  func.func @transform_11(%arg0: i32) -> i32 {
    %c0_i32 = arith.constant 0 : i32
    %c0_i32_0 = arith.constant 0 : i32
    return %c0_i32 : i32
  }
  func.func @transform_12(%arg0: i32) -> (i32, i32, i32) {
    %c0_i32 = arith.constant 0 : i32
    %c0_i32_0 = arith.constant 0 : i32
    %c0_i32_1 = arith.constant 0 : i32
    return %arg0, %c0_i32, %c0_i32_0 : i32, i32, i32
  }
}

</mosaic_0001>

<bundles_post_ra>
// kernel: p_net_forward.1
= control target key start
LH: loop header
LB: loop body
LE: loop exit
PB: predicated region body
PF: predicated region fallthrough
CT: control target
= control target key end

     0   :  { %17 = vsyncpa [#allocation3], 0  ;;  %s3146_s0 = inlined_call_operand.vmem [shape: bf16[2,27,267], index: 0, kind: input, shape index: {}]   ;;  %s3147_s1 = inlined_call_operand.vmem [shape: bf16[10,27], index: 1, kind: input, shape index: {}]   ;;  %s3148_s2 = inlined_call_operand.vmem [shape: f32[10,1], index: 2, kind: input, shape index: {}]   ;;  %s3149_s3 = inlined_call_operand.vmem [shape: bf16[16,90], index: 3, kind: input, shape index: {}]   ;;  %s3150_s4 = inlined_call_operand.vmem [shape: f32[16,1], index: 4, kind: input, shape index: {}]   ;;  %s3151_s5 = inlined_call_operand.vmem [shape: bf16[32,144], index: 5, kind: input, shape index: {}]   ;;  %s3152_s6 = inlined_call_operand.vmem [shape: f32[32,1], index: 6, kind: input, shape index: {}]   ;;  %s3153_s7 = inlined_call_operand.vmem [shape: bf16[15,32], index: 7, kind: input, shape index: {}]   ;;  %s3154_s8 = inlined_call_operand.vmem [shape: f32[15,1], index: 8, kind: input, shape index: {}]   ;;  %s3155_s9 = inlined_call_operand.vmem [shape: bf16[229,49], index: 9, kind: input, shape index: {}]   ;;  %s3156_s10 = inlined_call_operand.vmem [shape: bf16[17,9], index: 10, kind: input, shape index: {}]   ;;  %s3157_s11 = inlined_call_operand.vmem [shape: f32[3], index: 11, kind: input, shape index: {}]   ;;  %s3158_s12 = inlined_call_operand.vmem [shape: f32[2,15,9], index: 12, kind: output, shape index: {}]  }
   0x1   :  { %s46_s23 = sshll.u32 %s3157_s11, 4  ;;  %s47_s23 = int_to_ptr.vmem [resolvable:$true] %s46_s23 }
   0x2   :  { %s2392_s24 = scalar_lea.vmem %s47_s23, 16  ;;  %p2397_p1 = scmp.lt.s32.totalorder %s47_s23, %s47_s23 }
   0x3   :  { %p2393_p0 = scmp.ne.s32.totalorder %s47_s23, %s2392_s24  ;;  %p2398_p2 = scmp.lt.s32.totalorder %s2392_s24, %s2392_s24 }
   0x5   :  { %p2399_p3 = por %p2398_p2, %p2397_p1 }
   0x7   :  { %p2400_p4 = pnand %p2399_p3, %p2393_p0 }
   0x9   :  { %2403 = shalt.err (!%p2400_p4)
}
   0xa   :  { %s2406_s25 = smov [#allocation2]  }
   0xb   :  { %49 = dma.vmem_to_smem %s47_s23, 16, %s2406_s25, [#allocation3]  }
   0xc   :  { %2404 = dma.done.wait [#allocation3], 16  }
   0xd   :  { %2405 = vsyncadd [#allocation3], 4294967280 }
   0xe   :  { %53 = sfence }
   0xf   :  { %v2341_v0 = vld [vmem:[%s3146_s0 + $0x4] ss:$12 sps:$4 sm:$0xff]   ;;  %vm3159_vm0 = vcmask 1044480   ;;  %v2407_v1 = vmov 0.0   ;;  %v2343_v2 = vld [vmem:[%s3146_s0 + $0x8] ss:$12 sps:$4 sm:$0xff]  }
  0x10   :  { %1890 = vmatprep.subr.bf16.mxu1 %v2407_v1  ;;  %179 = vmatprep.subr.bf16.mxu0 %v2341_v0  ;;  %v2344_v3 = vld [vmem:[%s3146_s0] ss:$12 sps:$4 sm:$0xff]   ;;  %vm3163_vm1 = vcmask 1045504   ;;  %v2345_v4 = vld [vmem:[%s3146_s0 + $0x1c] ss:$12 sps:$4 sm:$0x3f]  }
  0x11   :  { %1891 = vmatpush3.bf16.msra.mxu1 %v2343_v2  ;;  %180 = vmatpush1.bf16.msra.mxu0 %v2344_v3  ;;  %v2408_v5 = vmov 65535   ;;  %v2347_v7 = vld [vmem:[%s3146_s0 + $0x20] ss:$12 sps:$4 sm:$0x3f]   ;;  %vm2409_vm2 = vmmov 0   ;;  %v2410_v12 = vmov 0  }
  0x12   :  { %1892 = vmatprep.subr.bf16.mxu1 %v2407_v1  ;;  %v168_v6 = vsel %vm3159_vm0, 4294967295, %v2408_v5  ;;  %v2348_v9 = vld [vmem:[%s3146_s0 + $0x18] ss:$12 sps:$4 sm:$0x3f]   ;;  %1894 = vmatprep.mubr.msk.bf16.mxu1 %vm2409_vm2, %v2407_v1  ;;  %vm162_vm3 = vcmask 220160   ;;  %v2550_v18 = vld [vmem:[%s3155_s9 + $0x8] sm:$0xff]  }
  0x13   :  { %v2513_v8 = vsel %vm3163_vm1, %v168_v6, 0  ;;  %211 = vmatprep.mubr.bf16.mxu0 %v2410_v12  ;;  %v2349_v14 = vld [vmem:[%s3147_s1] sm:$0x1f]   ;;  %1989 = vset.pattern.permute.xlu0 %v2410_v12  ;;  %v66_v16 = vld [vmem:[%s3148_s2 + $0x8] sm:$0x3]  ;;  %v2557_v19 = vld [vmem:[%s3155_s9 + $0x10] sm:$0xff]  }
  0x14   :  { %v174_v10 = vand.u32 %v2345_v4, %v2513_v8  ;;  %v177_v11 = vand.u32 %v2347_v7, %v2513_v8  ;;  %v171_v13 = vand.u32 %v2348_v9, %v2513_v8  ;;  %v65_v15 = vld [vmem:[%s3148_s2] sm:$0xff]  ;;  %2125 = vset.pattern.permute.xlu1 %v2410_v12  ;;  %v2564_v20 = vld [vmem:[%s3155_s9 + $0x18] sm:$0xff]   ;;  %s107_s13 = sld [smem:[#allocation2]]  ;;  %v2589_v37 = vld [vmem:[%s3155_s9 + $0x28] sm:$0xff]   ;;  %s2411_s20 = smov 126   ;;  %vm3164_vm10 = vcmask 1041408  }
  0x15   :  { %120 = vperm.xlu0 %1989, %v65_v15   ;;  %v2544_v17 = vld [vmem:[%s3155_s9] sm:$0xff]   ;;  %v2605_v44 = vld [vmem:[%s3155_s9 + $0x30] sm:$0xff]   ;;  %s2412_s21 = smov 127   ;;  %v2617_v49 = vld [vmem:[%s3155_s9 + $0x38] sm:$0xff]   ;;  %s2413_s24 = smov 110   ;;  %vm552_vm11 = vcmask 1042432  }
  0x16   :  { %181 = vmatprep.subr.bf16.mxu0 %v174_v10  ;;  %1893 = vmatpush3.bf16.msra.mxu1 %v177_v11  ;;  %v2576_v24 = vld [vmem:[%s3155_s9 + $0x20] sm:$0xff]   ;;  %s2414_s25 = smov 91   ;;  %s2415_s27 = smov 109   ;;  %v2644_v56 = vld [vmem:[%s3155_s9 + $0x48] sm:$0xff]   ;;  %v2653_v57 = vld [vmem:[%s3155_s9 + $0x50] sm:$0xff]   ;;  %v553_v3 = vsel %vm3164_vm10, 4294967295, %v2408_v5 }
  0x17   :  { %182 = vmatpush1.bf16.msra.mxu0 %v171_v13  ;;  %1898 = vmatprep.subr.bf16.mxu1 %v2407_v1  ;;  %v2631_v53 = vld [vmem:[%s3155_s9 + $0x40] sm:$0xff]   ;;  %s2416_s29 = smov 108   ;;  %s2417_s14 = smov 92   ;;  %v2663_v59 = vld [vmem:[%s3155_s9 + $0x58] sm:$0xff]   ;;  %v2683_v0 = vld [vmem:[%s3155_s9 + $0x68] sm:$0xff]   ;;  %v554_v4 = vsel %vm552_vm11, %v553_v3, 0 }
  0x18   :  { %558 = vmatprep.subr.bf16.mxu0 %v2410_v12  ;;  %s2418_s17 = smov 90   ;;  %v2673_v61 = vld [vmem:[%s3155_s9 + $0x60] sm:$0xff]   ;;  %v2364_v2 = vld [vmem:[%s3155_s9 + $0x70] ss:$0 sps:$4 sm:$0x77]   ;;  %vm294_vm12 = vcmask 1039360  }
  0x19   :  { %1895 = vmatmul.mubr.msk.bf16.vlgmr.msra.gmra.mrb[0].mxu1 %vm162_vm3, %v2349_v14  ;;  %125 = vperm.xlu0 %1989, %v66_v16   ;;  %v2693_v6 = vand.u32 %v2364_v2, %v554_v4  ;;  %vm313_vm13 = vcmask 1031168   ;;  %vm332_vm14 = vcmask 900096   ;;  %vm420_vm15 = vcmask 744448   ;;  %s2419_s9 = smov 120   ;;  %s2420_s11 = smov 121  }
  0x1a   :  { %1799 = vmatmul.mubr.msk.bf16.vlgmr.msra.gmra.mrb[0].mxu0 %vm162_vm3, %v2349_v14  ;;  %1910 = vmatprep.mubr.msk.bf16.mxu1 %vm2409_vm2, %v2407_v1  ;;  %v2578_v25 = vstv %s107_s13  ;;  %s2421_s28 = smov 114   ;;  %s2422_s30 = smov 119  }
  0x1b   :  { %559 = vmatpush1.bf16.msra.mxu0 %v2544_v17  ;;  %s2423_s13 = smov 112   ;;  %s3160_s15 = smov 113  }
  0x1c   :  { %560 = vmatprep.subr.bf16.mxu0 %v2410_v12  ;;  %s1790_s26 = sld [smem:[#allocation2 + $0x1]]  ;;  %s1791_s22 = sld [smem:[#allocation2 + $0x2]] }
  0x1f   :  { %561 = vmatpush1.bf16.msra.mxu0 %v2550_v18 }
  0x20   :  { %562 = vmatprep.subr.bf16.mxu0 %v2410_v12 }
  0x23   :  { %563 = vmatpush1.bf16.msra.mxu0 %v2557_v19 }
  0x24   :  { %564 = vmatprep.subr.bf16.mxu0 %v2410_v12 }
  0x27   :  { %565 = vmatpush1.bf16.msra.mxu0 %v2564_v20 }
  0x28   :  { %566 = vmatprep.subr.bf16.mxu0 %v2410_v12 }
  0x2b   :  { %567 = vmatpush1.bf16.msra.mxu0 %v2576_v24 }
  0x2c   :  { %568 = vmatprep.subr.bf16.mxu0 %v2410_v12 }
  0x2f   :  { %569 = vmatpush1.bf16.msra.mxu0 %v2589_v37 }
  0x30   :  { %570 = vmatprep.subr.bf16.mxu0 %v2410_v12 }
  0x33   :  { %571 = vmatpush1.bf16.msra.mxu0 %v2605_v44 }
  0x34   :  { %572 = vmatprep.subr.bf16.mxu0 %v2410_v12 }
  0x37   :  { %573 = vmatpush1.bf16.msra.mxu0 %v2617_v49 }
  0x38   :  { %574 = vmatprep.subr.bf16.mxu0 %v2410_v12 }
  0x3b   :  { %575 = vmatpush1.bf16.msra.mxu0 %v2631_v53 }
  0x3c   :  { %576 = vmatprep.subr.bf16.mxu0 %v2410_v12 }
  0x3f   :  { %577 = vmatpush1.bf16.msra.mxu0 %v2644_v56 }
  0x40   :  { %578 = vmatprep.subr.bf16.mxu0 %v2410_v12 }
  0x43   :  { %579 = vmatpush1.bf16.msra.mxu0 %v2653_v57 }
  0x44   :  { %580 = vmatprep.subr.bf16.mxu0 %v2410_v12 }
  0x47   :  { %581 = vmatpush1.bf16.msra.mxu0 %v2663_v59 }
  0x48   :  { %582 = vmatprep.subr.bf16.mxu0 %v2410_v12 }
  0x4b   :  { %583 = vmatpush1.bf16.msra.mxu0 %v2673_v61 }
  0x4c   :  { %584 = vmatprep.subr.bf16.mxu0 %v2410_v12 }
  0x4f   :  { %585 = vmatpush1.bf16.msra.mxu0 %v2683_v0 }
  0x50   :  { %586 = vmatprep.subr.bf16.mxu0 %v2410_v12 }
  0x53   :  { %587 = vmatpush1.bf16.msra.mxu0 %v2693_v6 }
  0x94   :  { %v2569_v21 = vpop.permute.xlu0 %120 }
  0x98   :  { %v2571_v23 = vpop.permute.xlu0 %125 }
  0xec   :  { %v256_v22 = vpop.f32.mrb[0].mxu1 }
  0xed   :  { %v213_v26 = vpop.f32.mrb[0].mxu0  ;;  %v1896_v27 = vpop.f32.mrb[1].mxu1  ;;  %v257_v31 = vadd.f32 %v256_v22, %v2569_v21 }
  0xee   :  { %v214_v28 = vadd.f32 %v213_v26, %v2569_v21  ;;  %v215_v29 = vpop.f32.mrb[1].mxu0  ;;  %v259_v30 = vpop.f32.mrb[2].mxu1 }
  0xef   :  { %v216_v32 = vadd.f32 %v215_v29, %v2569_v21  ;;  %v217_v33 = vpop.f32.mrb[2].mxu0  ;;  %v1897_v34 = vpop.f32.mrb[3].mxu1  ;;  %v272_v41 = vmul.f32 %v2578_v25, %v257_v31  ;;  %vm265_vm6 = vcmp.ge.f32.partialorder %v257_v31, 0.0  ;;  %v260_v58 = vadd.f32 %v259_v30, %v2571_v23 }
  0xf0   :  { %vm263_vm4 = vcmp.ge.f32.partialorder %v214_v28, 0.0  ;;  %v270_v35 = vmul.f32 %v2578_v25, %v214_v28  ;;  %v219_v36 = vpop.f32.mrb[3].mxu0  ;;  %v218_v39 = vadd.f32 %v217_v33, %v2571_v23 }
  0xf1   :  { %vm264_vm5 = vcmp.ge.f32.partialorder %v216_v32, 0.0  ;;  %v271_v38 = vmul.f32 %v2578_v25, %v216_v32  ;;  %v220_v46 = vadd.f32 %v219_v36, %v2571_v23  ;;  %v278_v47 = vsel %vm265_vm6, %v257_v31, %v272_v41 }
  0xf2   :  { %v2593_v40 = vsel %vm263_vm4, %v214_v28, %v270_v35  ;;  %v273_v45 = vmul.f32 %v2578_v25, %v218_v39  ;;  %vm266_vm7 = vcmp.ge.f32.partialorder %v218_v39, 0.0  ;;  %v275_v60 = vmul.f32 %v2578_v25, %v260_v58 }
  0xf3   :  { %v2597_v42 = vsel %vm264_vm5, %v216_v32, %v271_v38  ;;  %v274_v51 = vmul.f32 %v2578_v25, %v220_v46  ;;  %vm267_vm8 = vcmp.ge.f32.partialorder %v220_v46, 0.0  ;;  %vm268_vm9 = vcmp.ge.f32.partialorder %v260_v58, 0.0 }
  0xf4   :  { %v1995_v43 = vpack.i.bf16 %v2597_v42, %v2593_v40  ;;  %v2020_v48 = vpack.i.bf16 %v278_v47, %v2597_v42  ;;  %v2619_v50 = vsel %vm266_vm7, %v218_v39, %v273_v45  ;;  %v281_v62 = vsel %vm268_vm9, %v260_v58, %v275_v60 }
  0xf5   :  { %v2035_v52 = vpack.i.bf16 %v2619_v50, %v2593_v40  ;;  %v2633_v54 = vsel %vm267_vm8, %v220_v46, %v274_v51  ;;  %vm351_vm4 = vcmask 891904   ;;  %vm370_vm5 = vcmask 883712  }
  0xf6   :  { %1996 = vrot.lane.b32.xlu0 %v1995_v43, %s2411_s20  ;;  %1991 = vrot.lane.b32.xlu1 %v1995_v43, %s2412_s21  ;;  %v2040_v55 = vpack.i.bf16 %v2633_v54, %v2619_v50  ;;  %v2070_v63 = vpack.i.bf16 %v281_v62, %v2633_v54  ;;  %vm395_vm6 = vcmask 752640   ;;  %vm445_vm7 = vcmask 736256  }
  0xf7   :  { %vm547_vm8 = vcmask 826368   ;;  %vm610_vm9 = vcmask 1043456  }
  0xfa   :  { %2001 = vrot.lane.b32.xlu0 %v1995_v43, %s2413_s24  ;;  %2021 = vrot.lane.b32.xlu1 %v2020_v48, %s2414_s25 }
  0xfe   :  { %2006 = vrot.lane.b32.xlu0 %v1995_v43, %s2415_s27  ;;  %2036 = vrot.lane.b32.xlu1 %v2035_v52, %s2414_s25 }
 0x102   :  { %2011 = vrot.lane.b32.xlu0 %v1995_v43, %s2416_s29  ;;  %2041 = vrot.lane.b32.xlu1 %v2040_v55, %s2412_s21 }
 0x106   :  { %2016 = vrot.lane.b32.xlu0 %v2020_v48, %s2417_s14  ;;  %2046 = vrot.lane.b32.xlu1 %v2040_v55, %s2411_s20 }
 0x10a   :  { %2026 = vrot.lane.b32.xlu0 %v2020_v48, %s2418_s17  ;;  %2051 = vrot.lane.b32.xlu1 %v2040_v55, %s2413_s24 }
 0x10e   :  { %2031 = vrot.lane.b32.xlu0 %v2035_v52, %s2417_s14  ;;  %2056 = vrot.lane.b32.xlu1 %v2040_v55, %s2415_s27 }
 0x112   :  { %2071 = vrot.lane.b32.xlu0 %v2070_v63, %s2414_s25  ;;  %2061 = vrot.lane.b32.xlu1 %v2040_v55, %s2416_s29 }
 0x116   :  { %2081 = vrot.lane.b32.xlu0 %v2035_v52, %s2418_s17  ;;  %2066 = vrot.lane.b32.xlu1 %v2070_v63, %s2417_s14 }
 0x11a   :  { %2076 = vrot.lane.b32.xlu1 %v2070_v63, %s2418_s17 }
 0x168   :  { %v1997_v5 = vpop.permute.xlu0 %1996  ;;  %v1992_v7 = vpop.permute.xlu1 %1991 }
 0x169   :  { %v1994_v14 = vunpack.i.h.bf16 %v1992_v7  ;;  %v1993_v15 = vunpack.i.l.bf16 %v1992_v7  ;;  %v1999_v27 = vunpack.i.h.bf16 %v1997_v5  ;;  %v1998_v28 = vunpack.i.l.bf16 %v1997_v5 }
 0x16b   :  { %v295_v26 = vsel %vm294_vm12, %v1993_v15, %v1994_v14  ;;  %v302_v29 = vmax.f32 %v2597_v42, %v1994_v14  ;;  %v314_v38 = vsel %vm313_vm13, %v1998_v28, %v1999_v27 }
 0x16c   :  { %v2002_v9 = vpop.permute.xlu0 %2001  ;;  %v2700_v10 = vpop.permute.xlu1 %2021  ;;  %v301_v30 = vmax.f32 %v2593_v40, %v295_v26 }
 0x16d   :  { %v2004_v31 = vunpack.i.h.bf16 %v2002_v9  ;;  %v2003_v32 = vunpack.i.l.bf16 %v2002_v9  ;;  %v321_v39 = vmax.f32 %v302_v29, %v1999_v27  ;;  %v2024_v43 = vunpack.i.h.bf16 %v2700_v10 }
 0x16e   :  { %v320_v41 = vmax.f32 %v301_v30, %v314_v38  ;;  %v2023_v40 = vunpack.i.l.bf16 %v2700_v10 }
 0x16f   :  { %v333_v42 = vsel %vm332_vm14, %v2003_v32, %v2004_v31  ;;  %v340_v5 = vmax.f32 %v321_v39, %v2004_v31 }
 0x170   :  { %v2007_v11 = vpop.permute.xlu0 %2006  ;;  %v2702_v13 = vpop.permute.xlu1 %2036  ;;  %v339_v4 = vmax.f32 %v320_v41, %v333_v42  ;;  %v422_v7 = vsel %vm420_vm15, %v2023_v40, %v2024_v43 }
 0x171   :  { %v2009_v47 = vunpack.i.h.bf16 %v2007_v11  ;;  %v2008_v48 = vunpack.i.l.bf16 %v2007_v11  ;;  %v2039_v26 = vunpack.i.h.bf16 %v2702_v13  ;;  %v2038_v42 = vunpack.i.l.bf16 %v2702_v13 }
 0x173   :  { %v352_v11 = vsel %vm351_vm4, %v2008_v48, %v2009_v47 }
 0x174   :  { %v2012_v16 = vpop.permute.xlu0 %2011  ;;  %v2042_v22 = vpop.permute.xlu1 %2041 }
 0x175   :  { %v2044_v35 = vunpack.i.h.bf16 %v2042_v22  ;;  %v2043_v36 = vunpack.i.l.bf16 %v2042_v22  ;;  %v2014_v55 = vunpack.i.h.bf16 %v2012_v16  ;;  %v2013_v58 = vunpack.i.l.bf16 %v2012_v16 }
 0x176   :  { %v359_v22 = vmax.f32 %v340_v5, %v2009_v47 }
 0x177   :  { %v296_v60 = vsel %vm294_vm12, %v2043_v36, %v2044_v35  ;;  %v304_v27 = vmax.f32 %v2633_v54, %v2044_v35  ;;  %v371_v29 = vsel %vm370_vm5, %v2013_v58, %v2014_v55 }
 0x178   :  { %v2707_v33 = vpop.permute.xlu0 %2016  ;;  %v2047_v34 = vpop.permute.xlu1 %2046  ;;  %v303_v28 = vmax.f32 %v2619_v50, %v296_v60 }
 0x179   :  { %v2049_v51 = vunpack.i.h.bf16 %v2047_v34  ;;  %v2048_v52 = vunpack.i.l.bf16 %v2047_v34  ;;  %v2019_v62 = vunpack.i.h.bf16 %v2707_v33  ;;  %v2018_v63 = vunpack.i.l.bf16 %v2707_v33 }
 0x17a   :  { %v358_v33 = vmax.f32 %v339_v4, %v352_v11  ;;  %v378_v34 = vmax.f32 %v359_v22, %v2014_v55 }
 0x17b   :  { %v315_v14 = vsel %vm313_vm13, %v2048_v52, %v2049_v51  ;;  %v397_v30 = vsel %vm395_vm6, %v2018_v63, %v2019_v62  ;;  %v323_v38 = vmax.f32 %v304_v27, %v2049_v51 }
 0x17c   :  { %v2713_v45 = vpop.permute.xlu0 %2026  ;;  %v2052_v46 = vpop.permute.xlu1 %2051  ;;  %v322_v36 = vmax.f32 %v303_v28, %v315_v14  ;;  %v377_v50 = vmax.f32 %v358_v33, %v371_v29 }
 0x17d   :  { %v2054_v2 = vunpack.i.h.bf16 %v2052_v46  ;;  %v2053_v3 = vunpack.i.l.bf16 %v2052_v46  ;;  %v405_v46 = vmax.f32 %v378_v34, %v397_v30  ;;  %v2029_v52 = vunpack.i.h.bf16 %v2713_v45 }
 0x17e   :  { %v2028_v58 = vunpack.i.l.bf16 %v2713_v45 }
 0x17f   :  { %v334_v31 = vsel %vm332_vm14, %v2053_v3, %v2054_v2  ;;  %v342_v48 = vmax.f32 %v323_v38, %v2054_v2  ;;  %v421_v2 = vsel %vm420_vm15, %v2038_v42, %v2023_v40  ;;  %v430_v45 = vmax.f32 %v405_v46, %v422_v7 }
 0x180   :  { %v2032_v9 = vpop.permute.xlu0 %2031  ;;  %v2057_v10 = vpop.permute.xlu1 %2056  ;;  %v341_v47 = vmax.f32 %v322_v36, %v334_v31 }
 0x181   :  { %v2059_v15 = vunpack.i.h.bf16 %v2057_v10  ;;  %v2058_v16 = vunpack.i.l.bf16 %v2057_v10  ;;  %v2033_v32 = vunpack.i.l.bf16 %v2032_v9  ;;  %v2034_v10 = vunpack.i.h.bf16 %v2032_v9 }
 0x183   :  { %v353_v43 = vsel %vm351_vm4, %v2058_v16, %v2059_v15  ;;  %v396_v55 = vsel %vm395_vm6, %v2033_v32, %v2018_v63  ;;  %v361_v62 = vmax.f32 %v342_v48, %v2059_v15  ;;  %v447_v63 = vsel %vm445_vm7, %v2028_v58, %v2029_v52 }
 0x184   :  { %v2072_v39 = vpop.permute.xlu0 %2071  ;;  %v2062_v41 = vpop.permute.xlu1 %2061  ;;  %v360_v60 = vmax.f32 %v341_v47, %v353_v43  ;;  %v404_v22 = vmax.f32 %v377_v50, %v396_v55 }
 0x185   :  { %v2064_v54 = vunpack.i.h.bf16 %v2062_v41  ;;  %v2063_v35 = vunpack.i.l.bf16 %v2062_v41  ;;  %v2074_v3 = vunpack.i.h.bf16 %v2072_v39  ;;  %v2073_v13 = vunpack.i.l.bf16 %v2072_v39 }
 0x186   :  { %v429_v39 = vmax.f32 %v404_v22, %v421_v2 }
 0x187   :  { %v372_v51 = vsel %vm370_vm5, %v2063_v35, %v2064_v54  ;;  %v380_v28 = vmax.f32 %v361_v62, %v2064_v54  ;;  %v423_v30 = vsel %vm420_vm15, %v2039_v26, %v2073_v13  ;;  %v424_v31 = vsel %vm420_vm15, %v2073_v13, %v2074_v3 }
 0x188   :  { %v2082_v4 = vpop.permute.xlu0 %2081  ;;  %v2067_v5 = vpop.permute.xlu1 %2066  ;;  %v379_v27 = vmax.f32 %v360_v60, %v372_v51  ;;  %v455_v54 = vmax.f32 %v430_v45, %v447_v63 }
 0x189   :  { %v2083_v11 = vunpack.i.l.bf16 %v2082_v4  ;;  %v2069_v14 = vunpack.i.h.bf16 %v2067_v5  ;;  %v2068_v16 = vunpack.i.l.bf16 %v2067_v5  ;;  %v2084_v34 = vunpack.i.h.bf16 %v2082_v4 }
 0x18b   :  { %v398_v29 = vsel %vm395_vm6, %v2034_v10, %v2068_v16  ;;  %v399_v15 = vsel %vm395_vm6, %v2068_v16, %v2069_v14  ;;  %v446_v40 = vsel %vm445_vm7, %v2083_v11, %v2028_v58 }
 0x18c   :  { %v406_v9 = vmax.f32 %v379_v27, %v398_v29  ;;  %v407_v32 = vmax.f32 %v380_v28, %v399_v15  ;;  %v2077_v33 = vpop.permute.xlu1 %2076  ;;  %v454_v35 = vmax.f32 %v429_v39, %v446_v40  ;;  %v68_v27 = vld [vmem:[%s3150_s4 + $0x8] sm:$0xff]  ;;  %v67_v28 = vld [vmem:[%s3150_s4] sm:$0xff] }
 0x18d   :  { %v2079_v36 = vunpack.i.h.bf16 %v2077_v33  ;;  %v2078_v38 = vunpack.i.l.bf16 %v2077_v33 }
 0x18e   :  { %v431_v7 = vmax.f32 %v406_v9, %v423_v30  ;;  %v432_v41 = vmax.f32 %v407_v32, %v424_v31 }
 0x18f   :  { %v448_v42 = vsel %vm445_vm7, %v2084_v34, %v2078_v38  ;;  %v449_v43 = vsel %vm445_vm7, %v2078_v38, %v2079_v36 }
 0x190   :  { %v456_v26 = vmax.f32 %v431_v7, %v448_v42  ;;  %v457_v50 = vmax.f32 %v432_v41, %v449_v43 }
 0x192   :  { %v459_v46 = vpack.c.bf16 %v457_v50, %v455_v54  ;;  %v458_v47 = vpack.c.bf16 %v456_v26, %v454_v35 }
 0x194   :  { %1816 = vmatprep.mubr.msk.bf16.mxu0 %vm547_vm8, %v459_v46 }
 0x195   :  { %591 = vmatmul.mubr.bf16.vlgmr.msra.gmra.mrb[4].mxu0 %v458_v47 }
 0x268   :  { %v592_v48 = vpop.f32.mrb[4].mxu0 }
 0x269   :  { %v594_v52 = vpop.f32.mrb[5].mxu0  ;;  %v611_v55 = vrot.slane %v592_v48, 4  ;;  %v601_v51 = vrot.slane %v592_v48, 6  ;;  %v620_v60 = vrot.slane %v592_v48, 2 }
 0x26a   :  { %v595_v58 = vpop.f32.mrb[6].mxu0 }
 0x26b   :  { %v597_v62 = vpop.f32.mrb[7].mxu0  ;;  %v612_v3 = vrot.slane %v595_v58, 4  ;;  %v602_v13 = vrot.slane %v595_v58, 6  ;;  %v2100_v4 = vpack.i.bf16 %v595_v58, %v592_v48  ;;  %v621_v5 = vrot.slane %v595_v58, 2 }
 0x26d   :  { %v613_v10 = vsel %vm610_vm9, %v611_v55, %v612_v3  ;;  %v603_v11 = vsel %vm3164_vm10, %v601_v51, %v602_v13  ;;  %v622_v14 = vsel %vm3163_vm1, %v620_v60, %v621_v5 }
 0x26e   :  { %v2090_v16 = vpack.i.bf16 %v613_v10, %v611_v55  ;;  %v2085_v2 = vpack.i.bf16 %v603_v11, %v601_v51  ;;  %v2095_v22 = vpack.i.bf16 %v622_v14, %v620_v60  ;;  %v2775_v14 = vld [vmem:[%s3149_s3] sm:$0xff]  }
 0x270   :  { %2091 = vrot.lane.b32.xlu0 %v2090_v16, %s2411_s20  ;;  %2086 = vrot.lane.b32.xlu1 %v2085_v2, %s2412_s21 }
 0x274   :  { %2101 = vrot.lane.b32.xlu0 %v2100_v4, %s2419_s9  ;;  %2096 = vrot.lane.b32.xlu1 %v2095_v22, %s2420_s11 }
 0x278   :  { %2111 = vrot.lane.b32.xlu0 %v2090_v16, %s2421_s28  ;;  %2106 = vrot.lane.b32.xlu1 %v2085_v2, %s2422_s30 }
 0x27c   :  { %2121 = vrot.lane.b32.xlu0 %v2100_v4, %s2423_s13  ;;  %2116 = vrot.lane.b32.xlu1 %v2095_v22, %s3160_s15  ;;  %v2782_v22 = vstv %s1790_s26 }
 0x280   :  { %678 = vperm.xlu0 %1989, %v68_v27   ;;  %673 = vperm.xlu1 %2125, %v67_v28  }
 0x2e2   :  { %v2092_v45 = vpop.permute.xlu0 %2091  ;;  %v2087_v63 = vpop.permute.xlu1 %2086 }
 0x2e3   :  { %v2088_v29 = vunpack.i.l.bf16 %v2087_v63  ;;  %v2093_v15 = vunpack.i.l.bf16 %v2092_v45  ;;  %v2089_v30 = vunpack.i.h.bf16 %v2087_v63  ;;  %v2094_v34 = vunpack.i.h.bf16 %v2092_v45 }
 0x2e5   :  { %v659_v31 = vsel %vm3164_vm10, %v595_v58, %v2088_v29  ;;  %v660_v36 = vsel %vm610_vm9, %v2089_v30, %v2093_v15 }
 0x2e6   :  { %v665_v9 = vpack.c.bf16 %v659_v31, %v592_v48  ;;  %v2102_v32 = vpop.permute.xlu0 %2101  ;;  %v2097_v33 = vpop.permute.xlu1 %2096 }
 0x2e7   :  { %v2098_v40 = vunpack.i.l.bf16 %v2097_v33  ;;  %v2103_v39 = vunpack.i.l.bf16 %v2102_v32  ;;  %v2099_v7 = vunpack.i.h.bf16 %v2097_v33  ;;  %v2104_v50 = vunpack.i.h.bf16 %v2102_v32 }
 0x2e8   :  { %1899 = vmatpush3.bf16.msra.mxu1 %v665_v9 }
 0x2e9   :  { %v661_v38 = vsel %vm3163_vm1, %v2094_v34, %v2098_v40  ;;  %1900 = vmatprep.subr.bf16.mxu1 %v2407_v1  ;;  %v667_v46 = vpack.c.bf16 %v2103_v39, %v2099_v7  ;;  %v70_v40 = vld [vmem:[%s3152_s6 + $0x8] sm:$0xff]  ;;  %v71_v39 = vld [vmem:[%s3152_s6 + $0x10] sm:$0xff] }
 0x2ea   :  { %v666_v41 = vpack.c.bf16 %v661_v38, %v660_v36  ;;  %v2112_v42 = vpop.permute.xlu0 %2111  ;;  %v2107_v43 = vpop.permute.xlu1 %2106  ;;  %v69_v36 = vld [vmem:[%s3152_s6] sm:$0xff]  ;;  %v72_v38 = vld [vmem:[%s3152_s6 + $0x18] sm:$0xff] }
 0x2eb   :  { %v2113_v54 = vunpack.i.l.bf16 %v2112_v42  ;;  %v2109_v35 = vunpack.i.h.bf16 %v2107_v43  ;;  %v2108_v26 = vunpack.i.l.bf16 %v2107_v43  ;;  %v2114_v51 = vunpack.i.h.bf16 %v2112_v42  ;;  %v2814_v7 = vld [vmem:[%s3151_s5 + $0x4] ss:$8 sps:$4 sm:$0xff]  }
 0x2ec   :  { %1901 = vmatpush3.bf16.msra.mxu1 %v666_v41 }
 0x2ed   :  { %1902 = vmatprep.subr.bf16.mxu1 %v2407_v1  ;;  %v663_v48 = vsel %vm610_vm9, %v2109_v35, %v2113_v54  ;;  %v662_v52 = vsel %vm3164_vm10, %v2104_v50, %v2108_v26 }
 0x2ee   :  { %v2117_v47 = vpop.permute.xlu1 %2116  ;;  %v2122_v55 = vpop.permute.xlu0 %2121  ;;  %v668_v60 = vpack.c.bf16 %v663_v48, %v662_v52 }
 0x2ef   :  { %v2118_v58 = vunpack.i.l.bf16 %v2117_v47  ;;  %v2119_v62 = vunpack.i.h.bf16 %v2117_v47  ;;  %v2124_v3 = vunpack.i.h.bf16 %v2122_v55  ;;  %v2123_v13 = vunpack.i.l.bf16 %v2122_v55 }
 0x2f0   :  { %1903 = vmatpush3.bf16.msra.mxu1 %v667_v46 }
 0x2f1   :  { %1904 = vmatprep.subr.bf16.mxu1 %v2407_v1  ;;  %v664_v4 = vsel %vm3163_vm1, %v2114_v51, %v2118_v58  ;;  %v670_v10 = vpack.c.bf16 %v2124_v3, %v2123_v13  ;;  %vm3165_vm1 = vcmask 138240  }
 0x2f2   :  { %v669_v5 = vpack.c.bf16 %v2119_v62, %v664_v4 }
 0x2f3   :  { %v690_v11 = vsel %vm3159_vm0, %v670_v10, 0 }
 0x2f4   :  { %1905 = vmatpush3.bf16.msra.mxu1 %v668_v60 }
 0x2f5   :  { %1906 = vmatprep.subr.bf16.mxu1 %v2407_v1 }
 0x2f8   :  { %1907 = vmatpush3.bf16.msra.mxu1 %v669_v5 }
 0x2f9   :  { %1908 = vmatprep.subr.bf16.mxu1 %v2407_v1 }
 0x2fc   :  { %1909 = vmatpush3.bf16.msra.mxu1 %v690_v11 }
 0x2fd   :  { %844 = vmatprep.subr.bf16.mxu1 %v2410_v12 }
 0x2ff   :  { %1911 = vmatmul.mubr.msk.bf16.vlgmr.msra.gmra.mrb[4].mxu1 %vm445_vm7, %v2775_v14  ;;  %v2780_v16 = vpop.permute.xlu1 %673  ;;  %v2785_v45 = vpop.permute.xlu0 %678 }
 0x3d2   :  { %v726_v2 = vpop.f32.mrb[4].mxu1 }
 0x3d3   :  { %v727_v27 = vadd.f32 %v726_v2, %v2780_v16  ;;  %v1912_v28 = vpop.f32.mrb[5].mxu1 }
 0x3d4   :  { %v729_v63 = vpop.f32.mrb[6].mxu1 }
 0x3d5   :  { %v736_v29 = vmul.f32 %v2782_v22, %v727_v27  ;;  %v730_v15 = vadd.f32 %v729_v63, %v2785_v45  ;;  %v1913_v30 = vpop.f32.mrb[7].mxu1  ;;  %vm733_vm11 = vcmp.ge.f32.partialorder %v727_v27, 0.0 }
 0x3d7   :  { %vm734_vm0 = vcmp.ge.f32.partialorder %v730_v15, 0.0  ;;  %v737_v31 = vmul.f32 %v2782_v22, %v730_v15  ;;  %v738_v9 = vsel %vm733_vm11, %v727_v27, %v736_v29  ;;  %vm924_vm11 = vcmask 1040384  }
 0x3d9   :  { %v739_v32 = vsel %vm734_vm0, %v730_v15, %v737_v31  ;;  %vm3162_vm0 = vcmask 130048  }
 0x3da   :  { %v2131_v33 = vpack.i.bf16 %v739_v32, %v738_v9  ;;  %v790_v34 = vpack.c.bf16 %v739_v32, %v738_v9  ;;  %1823 = vmatprep.mubr.msk.bf16.mxu1 %vm3162_vm0, %v2814_v7  ;;  %v2374_v32 = vld [vmem:[%s3146_s0 + $0x34] ss:$12 sps:$4 sm:$0xff]  }
 0x3dc   :  { %2132 = vrot.lane.b32.xlu0 %v2131_v33, %s2411_s20  ;;  %2127 = vrot.lane.b32.xlu1 %v2131_v33, %s2412_s21 }
 0x3dd   :  { %845 = vmatpush1.bf16.msra.mxu1 %v790_v34 }
 0x3de   :  { %846 = vmatprep.subr.bf16.mxu1 %v2410_v12 }
 0x3e0   :  { %2142 = vrot.lane.b32.xlu0 %v2131_v33, %s2419_s9  ;;  %2137 = vrot.lane.b32.xlu1 %v2131_v33, %s2420_s11 }
 0x3e4   :  { %2152 = vrot.lane.b32.xlu0 %v2131_v33, %s2421_s28  ;;  %2147 = vrot.lane.b32.xlu1 %v2131_v33, %s2422_s30 }
 0x3e8   :  { %2162 = vrot.lane.b32.xlu0 %v2131_v33, %s2423_s13  ;;  %2157 = vrot.lane.b32.xlu1 %v2131_v33, %s3160_s15  ;;  %v2377_v33 = vld [vmem:[%s3146_s0 + $0x4c] ss:$12 sps:$4 sm:$0x3f]  }
 0x3ec   :  { %806 = vperm.xlu0 %1989, %v70_v40   ;;  %801 = vperm.xlu1 %2125, %v69_v36   ;;  %v2834_v40 = vld [vmem:[%s3151_s5] ss:$8 sps:$4 sm:$0xff]   ;;  %v2839_v36 = vld [vmem:[%s3151_s5 + $0x14] ss:$8 sps:$4 sm:$0xff]  }
 0x3f0   :  { %816 = vperm.xlu0 %1989, %v72_v38   ;;  %811 = vperm.xlu1 %2125, %v71_v39   ;;  %v2372_v38 = vld [vmem:[%s3146_s0 + $0x30] ss:$12 sps:$4 sm:$0xff]   ;;  %v2375_v39 = vld [vmem:[%s3146_s0 + $0x48] ss:$12 sps:$4 sm:$0x3f]  }
 0x44e   :  { %v2133_v41 = vpop.permute.xlu0 %2132  ;;  %v2128_v42 = vpop.permute.xlu1 %2127 }
 0x44f   :  { %v2130_v43 = vunpack.i.h.bf16 %v2128_v42  ;;  %v2129_v54 = vunpack.i.l.bf16 %v2128_v42  ;;  %v2135_v35 = vunpack.i.h.bf16 %v2133_v41  ;;  %v2134_v26 = vunpack.i.l.bf16 %v2133_v41 }
 0x450   :  { %v1106_v41 = vand.u32 %v2377_v33, %v2513_v8  ;;  %v1103_v42 = vand.u32 %v2375_v39, %v2513_v8 }
 0x451   :  { %v791_v50 = vpack.c.bf16 %v2130_v43, %v2129_v54  ;;  %v792_v47 = vpack.c.bf16 %v2135_v35, %v2134_v26  ;;  %v2855_v43 = vld [vmem:[%s3151_s5 + $0x10] ss:$8 sps:$4 sm:$0xff]   ;;  %v2863_v54 = vld [vmem:[%s3147_s1] sm:$0x1f]  }
 0x452   :  { %v2138_v46 = vpop.permute.xlu1 %2137  ;;  %v2143_v58 = vpop.permute.xlu0 %2142 }
 0x453   :  { %847 = vmatpush1.bf16.msra.mxu1 %v791_v50  ;;  %v2140_v48 = vunpack.i.h.bf16 %v2138_v46  ;;  %v2139_v52 = vunpack.i.l.bf16 %v2138_v46  ;;  %v2145_v55 = vunpack.i.h.bf16 %v2143_v58  ;;  %v2144_v51 = vunpack.i.l.bf16 %v2143_v58 }
 0x454   :  { %848 = vmatprep.subr.bf16.mxu1 %v2410_v12 }
 0x455   :  { %v793_v60 = vpack.c.bf16 %v2140_v48, %v2139_v52  ;;  %v794_v3 = vpack.c.bf16 %v2145_v55, %v2144_v51 }
 0x456   :  { %v2148_v62 = vpop.permute.xlu1 %2147  ;;  %v2153_v5 = vpop.permute.xlu0 %2152 }
 0x457   :  { %849 = vmatpush1.bf16.msra.mxu1 %v792_v47  ;;  %v2150_v13 = vunpack.i.h.bf16 %v2148_v62  ;;  %v2149_v4 = vunpack.i.l.bf16 %v2148_v62  ;;  %v2155_v10 = vunpack.i.h.bf16 %v2153_v5  ;;  %v2154_v11 = vunpack.i.l.bf16 %v2153_v5 }
 0x458   :  { %850 = vmatprep.subr.bf16.mxu1 %v2410_v12 }
 0x459   :  { %v795_v2 = vpack.c.bf16 %v2150_v13, %v2149_v4  ;;  %v796_v28 = vpack.c.bf16 %v2155_v10, %v2154_v11 }
 0x45a   :  { %v2158_v27 = vpop.permute.xlu1 %2157  ;;  %v2163_v15 = vpop.permute.xlu0 %2162 }
 0x45b   :  { %851 = vmatpush1.bf16.msra.mxu1 %v793_v60  ;;  %v2160_v63 = vunpack.i.h.bf16 %v2158_v27  ;;  %v2159_v29 = vunpack.i.l.bf16 %v2158_v27  ;;  %v2165_v30 = vunpack.i.h.bf16 %v2163_v15  ;;  %v2164_v31 = vunpack.i.l.bf16 %v2163_v15 }
 0x45c   :  { %852 = vmatprep.subr.bf16.mxu1 %v2410_v12 }
 0x45d   :  { %v797_v9 = vpack.c.bf16 %v2160_v63, %v2159_v29  ;;  %v798_v34 = vpack.c.bf16 %v2165_v30, %v2164_v31 }
 0x45f   :  { %853 = vmatpush1.bf16.msra.mxu1 %v794_v3 }
 0x460   :  { %854 = vmatprep.subr.bf16.mxu1 %v2410_v12 }
 0x463   :  { %855 = vmatpush1.bf16.msra.mxu1 %v795_v2 }
 0x464   :  { %856 = vmatprep.subr.bf16.mxu1 %v2410_v12 }
 0x467   :  { %857 = vmatpush1.bf16.msra.mxu1 %v796_v28 }
 0x468   :  { %858 = vmatprep.subr.bf16.mxu1 %v2410_v12 }
 0x46b   :  { %859 = vmatpush1.bf16.msra.mxu1 %v797_v9 }
 0x46c   :  { %860 = vmatprep.subr.bf16.mxu1 %v2410_v12 }
 0x46f   :  { %861 = vmatpush1.bf16.msra.mxu1 %v798_v34 }
 0x470   :  { %1111 = vmatprep.subr.bf16.mxu1 %v2374_v32 }
 0x472   :  { %877 = vmatmul.mubr.bf16.vlgmr.msra.gmra.mrb[8].mxu1 %v2834_v40 }
 0x473   :  { %1824 = vmatprep.mubr.msk.bf16.mxu1 %vm3162_vm0, %v2839_v36  ;;  %1112 = vmatpush1.bf16.msra.mxu1 %v2372_v38 }
 0x474   :  { %1113 = vmatprep.subr.bf16.mxu1 %v1106_v41 }
 0x477   :  { %1114 = vmatpush1.bf16.msra.mxu1 %v1103_v42 }
 0x478   :  { %1386 = vmatprep.subr.bf16.mxu1 %v2410_v12 }
 0x47a   :  { %885 = vmatmul.mubr.bf16.gmra.mrb[12].mxu1 %v2855_v43 }
 0x47b   :  { %1143 = vmatprep.mubr.bf16.mxu1 %v2410_v12 }
 0x482   :  { %1845 = vmatmul.mubr.msk.bf16.vlgmr.msra.gmra.mrb[16].mxu1 %vm162_vm3, %v2863_v54 }
 0x483   :  { %1387 = vmatpush1.bf16.msra.mxu1 %v2544_v17  ;;  %v2899_v17 = vld [vmem:[%s3156_s10] sm:$0xff]  }
 0x484   :  { %1388 = vmatprep.subr.bf16.mxu1 %v2410_v12  ;;  %1914 = vmatprep.subr.bf16.mxu0 %v2899_v17 }
 0x485   :  { %1915 = vmatpush3.bf16.msra.mxu0 %v2899_v17 }
 0x487   :  { %1389 = vmatpush1.bf16.msra.mxu1 %v2550_v18  ;;  %v2379_v18 = vld [vmem:[%s3156_s10 + $0x8] ss:$0 sps:$4 sm:$0x11]  }
 0x488   :  { %1390 = vmatprep.subr.bf16.mxu1 %v2410_v12 }
 0x48b   :  { %1391 = vmatpush1.bf16.msra.mxu1 %v2557_v19  ;;  %v926_v19 = vsel %vm924_vm11, 65535, %v2410_v12 }
 0x48c   :  { %1392 = vmatprep.subr.bf16.mxu1 %v2410_v12 }
 0x48f   :  { %1393 = vmatpush1.bf16.msra.mxu1 %v2564_v20  ;;  %v2908_v20 = vand.u32 %v2379_v18, %v926_v19 }
 0x490   :  { %1394 = vmatprep.subr.bf16.mxu1 %v2410_v12 }
 0x491   :  { %1916 = vmatprep.subr.bf16.mxu0 %v2908_v20 }
 0x492   :  { %1917 = vmatpush3.bf16.msra.mxu0 %v2908_v20 }
 0x493   :  { %1395 = vmatpush1.bf16.msra.mxu1 %v2576_v24  ;;  %1922 = vmatprep.subr.bf16.mxu0 %v2407_v1  ;;  %v2913_v24 = vpop.permute.xlu1 %801 }
 0x494   :  { %1396 = vmatprep.subr.bf16.mxu1 %v2410_v12 }
 0x497   :  { %1397 = vmatpush1.bf16.msra.mxu1 %v2589_v37  ;;  %v2923_v50 = vpop.permute.xlu1 %811 }
 0x498   :  { %1398 = vmatprep.subr.bf16.mxu1 %v2410_v12 }
 0x49b   :  { %1399 = vmatpush1.bf16.msra.mxu1 %v2605_v44  ;;  %v2915_v44 = vstv %s1791_s22 }
 0x49c   :  { %1400 = vmatprep.subr.bf16.mxu1 %v2410_v12 }
 0x49f   :  { %1401 = vmatpush1.bf16.msra.mxu1 %v2617_v49 }
 0x4a0   :  { %1402 = vmatprep.subr.bf16.mxu1 %v2410_v12 }
 0x4a3   :  { %1403 = vmatpush1.bf16.msra.mxu1 %v2631_v53 }
 0x4a4   :  { %1404 = vmatprep.subr.bf16.mxu1 %v2410_v12 }
 0x4a7   :  { %1405 = vmatpush1.bf16.msra.mxu1 %v2644_v56  ;;  %v2918_v56 = vpop.permute.xlu0 %806 }
 0x4a8   :  { %1406 = vmatprep.subr.bf16.mxu1 %v2410_v12 }
 0x4ab   :  { %1407 = vmatpush1.bf16.msra.mxu1 %v2653_v57  ;;  %v2926_v58 = vpop.permute.xlu0 %816 }
 0x4ac   :  { %1408 = vmatprep.subr.bf16.mxu1 %v2410_v12 }
 0x4af   :  { %1409 = vmatpush1.bf16.msra.mxu1 %v2663_v59 }
 0x4b0   :  { %1410 = vmatprep.subr.bf16.mxu1 %v2410_v12 }
 0x4b3   :  { %1411 = vmatpush1.bf16.msra.mxu1 %v2673_v61 }
 0x4b4   :  { %1412 = vmatprep.subr.bf16.mxu1 %v2410_v12 }
 0x4b7   :  { %1413 = vmatpush1.bf16.msra.mxu1 %v2683_v0 }
 0x4b8   :  { %1414 = vmatprep.subr.bf16.mxu1 %v2410_v12 }
 0x4bb   :  { %1415 = vmatpush1.bf16.msra.mxu1 %v2693_v6 }
 0x4bc   :  { %1954 = vmatprep.subr.bf16.mxu1 %v2899_v17 }
 0x545   :  { %v878_v37 = vpop.f32.mrb[8].mxu1 }
 0x546   :  { %v879_v49 = vadd.f32 %v878_v37, %v2913_v24  ;;  %v880_v53 = vpop.f32.mrb[9].mxu1 }
 0x547   :  { %v881_v57 = vpop.f32.mrb[10].mxu1 }
 0x548   :  { %v898_v59 = vmul.f32 %v2915_v44, %v879_v49  ;;  %v882_v61 = vadd.f32 %v881_v57, %v2918_v56  ;;  %v883_v0 = vpop.f32.mrb[11].mxu1  ;;  %vm893_vm11 = vcmp.ge.f32.partialorder %v879_v49, 0.0 }
 0x549   :  { %v2381_v0 = vld [vmem:[%s3146_s0 + $0x38] ss:$12 sps:$4 sm:$0xff]  }
 0x54a   :  { %vm894_vm0 = vcmp.ge.f32.partialorder %v882_v61, 0.0  ;;  %v899_v6 = vmul.f32 %v2915_v44, %v882_v61  ;;  %v902_v35 = vsel %vm893_vm11, %v879_v49, %v898_v59 }
 0x54c   :  { %v903_v26 = vsel %vm894_vm0, %v882_v61, %v899_v6  ;;  %v2973_v61 = vld [vmem:[%s3153_s7] sm:$0xff]   ;;  %v2382_v6 = vld [vmem:[%s3146_s0 + $0x50] ss:$12 sps:$4 sm:$0x3f]   ;;  %s3168_s0 = smov 113  }
 0x54d   :  { %v906_v46 = vpack.c.bf16 %v903_v26, %v902_v35  ;;  %v886_v47 = vpop.f32.mrb[12].mxu1  ;;  %v1109_v35 = vand.u32 %v2382_v6, %v2513_v8 }
 0x54e   :  { %v887_v48 = vadd.f32 %v886_v47, %v2923_v50  ;;  %v888_v52 = vpop.f32.mrb[13].mxu1 }
 0x54f   :  { %v889_v55 = vpop.f32.mrb[14].mxu1  ;;  %1918 = vmatprep.mubr.msk.bf16.mxu0 %vm3165_vm1, %v906_v46 }
 0x550   :  { %v900_v51 = vmul.f32 %v2915_v44, %v887_v48  ;;  %v890_v60 = vadd.f32 %v889_v55, %v2926_v58  ;;  %v891_v62 = vpop.f32.mrb[15].mxu1  ;;  %vm895_vm11 = vcmp.ge.f32.partialorder %v887_v48, 0.0 }
 0x552   :  { %vm896_vm0 = vcmp.ge.f32.partialorder %v890_v60, 0.0  ;;  %v901_v3 = vmul.f32 %v2915_v44, %v890_v60  ;;  %v904_v13 = vsel %vm895_vm11, %v887_v48, %v900_v51 }
 0x554   :  { %v905_v4 = vsel %vm896_vm0, %v890_v60, %v901_v3 }
 0x555   :  { %v907_v5 = vpack.c.bf16 %v905_v4, %v904_v13  ;;  %v1145_v10 = vpop.f32.mrb[16].mxu1 }
 0x556   :  { %v1146_v11 = vadd.f32 %v1145_v10, %v2569_v21  ;;  %v1147_v2 = vpop.f32.mrb[17].mxu1 }
 0x557   :  { %v1148_v27 = vadd.f32 %v1147_v2, %v2569_v21  ;;  %1919 = vmatmul.mubr.msk.bf16.vlgmr.msra.gmra.mrb[8].mxu0 %vm3165_vm1, %v907_v5  ;;  %v1149_v28 = vpop.f32.mrb[18].mxu1 }
 0x558   :  { %vm1195_vm10 = vcmp.ge.f32.partialorder %v1146_v11, 0.0  ;;  %v1201_v63 = vmul.f32 %v1146_v11, %v2578_v25  ;;  %v1150_v29 = vadd.f32 %v1149_v28, %v2571_v23  ;;  %v1151_v15 = vpop.f32.mrb[19].mxu1  ;;  %1926 = vmatprep.mubr.msk.bf16.mxu0 %vm2409_vm2, %v2407_v1 }
 0x559   :  { %vm1196_vm11 = vcmp.ge.f32.partialorder %v1148_v27, 0.0  ;;  %v1202_v30 = vmul.f32 %v1148_v27, %v2578_v25  ;;  %v1152_v31 = vadd.f32 %v1151_v15, %v2571_v23 }
 0x55a   :  { %v2941_v9 = vsel %vm1195_vm10, %v1146_v11, %v1201_v63  ;;  %vm1198_vm0 = vcmp.ge.f32.partialorder %v1150_v29, 0.0  ;;  %v1204_v32 = vmul.f32 %v1150_v29, %v2578_v25 }
 0x55b   :  { %v2944_v33 = vsel %vm1196_vm11, %v1148_v27, %v1202_v30  ;;  %vm1199_vm1 = vcmp.ge.f32.partialorder %v1152_v31, 0.0  ;;  %v1205_v34 = vmul.f32 %v1152_v31, %v2578_v25 }
 0x55c   :  { %v2947_v38 = vsel %vm1198_vm0, %v1150_v29, %v1204_v32  ;;  %v2166_v39 = vpack.i.bf16 %v2944_v33, %v2941_v9 }
 0x55d   :  { %v2196_v41 = vpack.i.bf16 %v2947_v38, %v2941_v9  ;;  %v2953_v42 = vsel %vm1199_vm1, %v1152_v31, %v1205_v34  ;;  %vm996_vm1 = vcmask 261120  }
 0x55e   :  { %2167 = vrot.lane.b32.xlu1 %v2166_v39, %s2412_s21  ;;  %v2201_v18 = vpack.i.bf16 %v2953_v42, %v2947_v38 }
 0x55f   :  { %2197 = vrot.lane.b32.xlu0 %v2196_v41, %s2414_s25 }
 0x562   :  { %2172 = vrot.lane.b32.xlu1 %v2166_v39, %s2411_s20 }
 0x563   :  { %2202 = vrot.lane.b32.xlu0 %v2201_v18, %s2412_s21 }
 0x566   :  { %2177 = vrot.lane.b32.xlu1 %v2166_v39, %s2413_s24 }
 0x567   :  { %2207 = vrot.lane.b32.xlu0 %v2201_v18, %s2411_s20 }
 0x56a   :  { %2182 = vrot.lane.b32.xlu1 %v2166_v39, %s2415_s27 }
 0x56b   :  { %2212 = vrot.lane.b32.xlu0 %v2201_v18, %s2413_s24 }
 0x56e   :  { %2187 = vrot.lane.b32.xlu1 %v2166_v39, %s2416_s29 }
 0x56f   :  { %2217 = vrot.lane.b32.xlu0 %v2201_v18, %s2415_s27 }
 0x572   :  { %2192 = vrot.lane.b32.xlu1 %v2196_v41, %s2417_s14 }
 0x573   :  { %2222 = vrot.lane.b32.xlu0 %v2201_v18, %s2416_s29 }
 0x62a   :  { %v1920_v19 = vpop.f32.mrb[8].mxu0 }
 0x62b   :  { %v964_v37 = vpop.f32.mrb[9].mxu0 }
 0x62c   :  { %v1921_v49 = vpop.f32.mrb[10].mxu0 }
 0x62d   :  { %v980_v53 = vpack.c.bf16 %v1921_v49, %v1920_v19  ;;  %v967_v57 = vpop.f32.mrb[11].mxu0 }
 0x62e   :  { %v979_v59 = vpack.c.bf16 %v967_v57, %v964_v37 }
 0x630   :  { %1923 = vmatpush3.bf16.msra.mxu0 %v979_v59 }
 0x631   :  { %1924 = vmatprep.subr.bf16.mxu0 %v2407_v1 }
 0x634   :  { %1925 = vmatpush3.bf16.msra.mxu0 %v980_v53 }
 0x635   :  { %1930 = vmatprep.subr.bf16.mxu0 %v2407_v1 }
 0x637   :  { %1927 = vmatmul.mubr.msk.bf16.vlgmr.msra.gmra.mrb[12].mxu0 %vm996_vm1, %v2973_v61 }
 0x638   :  { %1931 = vmatpush3.bf16.msra.mxu0 %v2381_v0  ;;  %1934 = vmatprep.mubr.msk.bf16.mxu0 %vm2409_vm2, %v2407_v1 }
 0x639   :  { %1932 = vmatprep.subr.bf16.mxu0 %v2407_v1 }
 0x63c   :  { %1933 = vmatpush3.bf16.msra.mxu0 %v1109_v35 }
 0x63d   :  { %1938 = vmatprep.subr.bf16.mxu0 %v2407_v1 }
 0x63f   :  { %1935 = vmatmul.mubr.msk.bf16.vlgmr.msra.gmra.mrb[16].mxu0 %vm162_vm3, %v2863_v54 }
 0x640   :  { %1950 = vmatprep.mubr.msk.bf16.mxu0 %vm2409_vm2, %v2407_v1 }
 0x70a   :  { %v2993_v26 = vpop.f32.mrb[12].mxu0 }
 0x70b   :  { %v1928_v46 = vpop.f32.mrb[13].mxu0 }
 0x70c   :  { %v2995_v47 = vpop.f32.mrb[14].mxu0 }
 0x70d   :  { %v1929_v8 = vpop.f32.mrb[15].mxu0 }
 0x712   :  { %v1188_v48 = vpop.f32.mrb[16].mxu0 }
 0x713   :  { %v1189_v52 = vadd.f32 %v1188_v48, %v2569_v21  ;;  %v1936_v55 = vpop.f32.mrb[17].mxu0 }
 0x714   :  { %v1191_v51 = vpop.f32.mrb[18].mxu0 }
 0x715   :  { %vm1197_vm10 = vcmp.ge.f32.partialorder %v1189_v52, 0.0  ;;  %v1203_v60 = vmul.f32 %v1189_v52, %v2578_v25  ;;  %v1192_v62 = vadd.f32 %v1191_v51, %v2571_v23  ;;  %v1937_v54 = vpop.f32.mrb[19].mxu0  ;;  %v2168_v23 = vpop.permute.xlu1 %2167 }
 0x716   :  { %v2170_v29 = vunpack.i.h.bf16 %v2168_v23  ;;  %v2169_v15 = vunpack.i.l.bf16 %v2168_v23 }
 0x717   :  { %v1209_v3 = vsel %vm1197_vm10, %v1189_v52, %v1203_v60  ;;  %vm1200_vm3 = vcmp.ge.f32.partialorder %v1192_v62, 0.0  ;;  %v1206_v13 = vmul.f32 %v1192_v62, %v2578_v25  ;;  %v3010_v25 = vpop.permute.xlu0 %2197 }
 0x718   :  { %v2231_v4 = vpack.i.bf16 %v1209_v3, %v2944_v33  ;;  %v1225_v19 = vsel %vm294_vm12, %v2169_v15, %v2170_v29  ;;  %v1232_v57 = vmax.f32 %v2944_v33, %v2170_v29 }
 0x719   :  { %v1212_v5 = vsel %vm1200_vm3, %v1192_v62, %v1206_v13  ;;  %v2173_v10 = vpop.permute.xlu1 %2172  ;;  %v1231_v0 = vmax.f32 %v2941_v9, %v1225_v19  ;;  %vm1060_vm3 = vcmask 72704  }
 0x71a   :  { %2232 = vrot.lane.b32.xlu0 %v2231_v4, %s2414_s25  ;;  %2227 = vrot.lane.b32.xlu1 %v2231_v4, %s2417_s14  ;;  %v2241_v21 = vpack.i.bf16 %v1212_v5, %v2953_v42  ;;  %v2175_v30 = vunpack.i.h.bf16 %v2173_v10  ;;  %v2174_v31 = vunpack.i.l.bf16 %v2173_v10 }
 0x71b   :  { %v2203_v11 = vpop.permute.xlu0 %2202 }
 0x71c   :  { %v2205_v39 = vunpack.i.h.bf16 %v2203_v11  ;;  %v2204_v18 = vunpack.i.l.bf16 %v2203_v11  ;;  %v1243_v59 = vsel %vm313_vm13, %v2174_v31, %v2175_v30  ;;  %v1250_v8 = vmax.f32 %v1232_v57, %v2175_v30 }
 0x71d   :  { %v2178_v2 = vpop.permute.xlu1 %2177  ;;  %v1249_v62 = vmax.f32 %v1231_v0, %v1243_v59 }
 0x71e   :  { %2237 = vrot.lane.b32.xlu1 %v2231_v4, %s2418_s17  ;;  %2242 = vrot.lane.b32.xlu0 %v2241_v21, %s2417_s14  ;;  %v2179_v37 = vunpack.i.l.bf16 %v2178_v2  ;;  %v1226_v6 = vsel %vm294_vm12, %v2204_v18, %v2205_v39  ;;  %v1234_v13 = vmax.f32 %v2953_v42, %v2205_v39  ;;  %v2200_v39 = vunpack.i.h.bf16 %v3010_v25 }
 0x71f   :  { %v2208_v27 = vpop.permute.xlu0 %2207  ;;  %v1233_v9 = vmax.f32 %v2947_v38, %v1226_v6  ;;  %vm3166_vm12 = vcmask 1041408  }
 0x720   :  { %v2210_v49 = vunpack.i.h.bf16 %v2208_v27  ;;  %v2209_v53 = vunpack.i.l.bf16 %v2208_v27 }
 0x721   :  { %v2183_v28 = vpop.permute.xlu1 %2182 }
 0x722   :  { %2247 = vrot.lane.b32.xlu1 %v2241_v21, %s2414_s25  ;;  %2252 = vrot.lane.b32.xlu0 %v2241_v21, %s2418_s17  ;;  %v2185_v35 = vunpack.i.h.bf16 %v2183_v28  ;;  %v2184_v46 = vunpack.i.l.bf16 %v2183_v28  ;;  %v1244_v54 = vsel %vm313_vm13, %v2209_v53, %v2210_v49  ;;  %v1252_v10 = vmax.f32 %v1234_v13, %v2210_v49 }
 0x723   :  { %v2213_v63 = vpop.permute.xlu0 %2212  ;;  %v1251_v23 = vmax.f32 %v1233_v9, %v1244_v54  ;;  %vm3167_vm13 = vcmask 1045504  }
 0x724   :  { %v2215_v52 = vunpack.i.h.bf16 %v2213_v63  ;;  %v2214_v55 = vunpack.i.l.bf16 %v2213_v63  ;;  %v1279_v21 = vsel %vm351_vm4, %v2184_v46, %v2185_v35 }
 0x725   :  { %v2188_v32 = vpop.permute.xlu1 %2187 }
 0x726   :  { %2257 = vrot.lane.b32.xlu1 %v2196_v41, %s2418_s17  ;;  %v2180_v41 = vunpack.i.h.bf16 %v2178_v2  ;;  %v2190_v3 = vunpack.i.h.bf16 %v2188_v32  ;;  %v2189_v33 = vunpack.i.l.bf16 %v2188_v32  ;;  %v1262_v11 = vsel %vm332_vm14, %v2214_v55, %v2215_v52 }
 0x727   :  { %v2218_v34 = vpop.permute.xlu0 %2217  ;;  %v1269_v18 = vmax.f32 %v1251_v23, %v1262_v11  ;;  %v1270_v19 = vmax.f32 %v1252_v10, %v2215_v52 }
 0x728   :  { %v1261_v48 = vsel %vm332_vm14, %v2179_v37, %v2180_v41  ;;  %v1268_v5 = vmax.f32 %v1250_v8, %v2180_v41  ;;  %v2220_v2 = vunpack.i.h.bf16 %v2218_v34  ;;  %v1297_v63 = vsel %vm370_vm5, %v2189_v33, %v2190_v3  ;;  %vm3169_vm14 = vmmov %vm3166_vm12 }
 0x729   :  { %v2193_v51 = vpop.permute.xlu1 %2192  ;;  %v1267_v4 = vmax.f32 %v1249_v62, %v1261_v48  ;;  %v2219_v29 = vunpack.i.l.bf16 %v2218_v34 }
 0x72a   :  { %v1286_v42 = vmax.f32 %v1268_v5, %v2185_v35  ;;  %v2194_v6 = vunpack.i.l.bf16 %v2193_v51  ;;  %v1288_v35 = vmax.f32 %v1270_v19, %v2220_v2  ;;  %v2195_v48 = vunpack.i.h.bf16 %v2193_v51 }
 0x72b   :  { %v2223_v60 = vpop.permute.xlu0 %2222  ;;  %v1285_v31 = vmax.f32 %v1267_v4, %v1279_v21  ;;  %v1280_v34 = vsel %vm351_vm4, %v2219_v29, %v2220_v2  ;;  %v2199_v29 = vunpack.i.l.bf16 %v3010_v25  ;;  %vm3171_vm4 = vmmov %vm3166_vm12 }
 0x72c   :  { %v2225_v32 = vunpack.i.h.bf16 %v2223_v60  ;;  %v2224_v38 = vunpack.i.l.bf16 %v2223_v60  ;;  %v1304_v49 = vmax.f32 %v1286_v42, %v2190_v3  ;;  %v1287_v33 = vmax.f32 %v1269_v18, %v1280_v34 }
 0x72d   :  { %v1303_v37 = vmax.f32 %v1285_v31, %v1297_v63 }
 0x72e   :  { %v1298_v55 = vsel %vm370_vm5, %v2224_v38, %v2225_v32  ;;  %v1306_v13 = vmax.f32 %v1288_v35, %v2225_v32  ;;  %vm3172_vm5 = vmmov %vm3167_vm13 }
 0x72f   :  { %v1305_v2 = vmax.f32 %v1287_v33, %v1298_v55 }
 0x78c   :  { %v2233_v27 = vpop.permute.xlu0 %2232  ;;  %v2228_v28 = vpop.permute.xlu1 %2227 }
 0x78d   :  { %v2230_v15 = vunpack.i.h.bf16 %v2228_v28  ;;  %v2229_v30 = vunpack.i.l.bf16 %v2228_v28  ;;  %v2235_v53 = vunpack.i.h.bf16 %v2233_v27  ;;  %v2234_v57 = vunpack.i.l.bf16 %v2233_v27 }
 0x78f   :  { %v1322_v41 = vsel %vm395_vm6, %v2229_v30, %v2230_v15  ;;  %v1321_v52 = vsel %vm395_vm6, %v2194_v6, %v2229_v30  ;;  %v1346_v9 = vsel %vm420_vm15, %v2234_v57, %v2235_v53  ;;  %v1345_v18 = vsel %vm420_vm15, %v2199_v29, %v2234_v57 }
 0x790   :  { %v2238_v59 = vpop.permute.xlu1 %2237  ;;  %v2243_v0 = vpop.permute.xlu0 %2242  ;;  %v1330_v60 = vmax.f32 %v1304_v49, %v1322_v41  ;;  %v1329_v27 = vmax.f32 %v1303_v37, %v1321_v52 }
 0x791   :  { %v2245_v46 = vunpack.i.h.bf16 %v2243_v0  ;;  %v2244_v8 = vunpack.i.l.bf16 %v2243_v0  ;;  %v2240_v62 = vunpack.i.h.bf16 %v2238_v59  ;;  %v2239_v54 = vunpack.i.l.bf16 %v2238_v59 }
 0x792   :  { %v1354_v28 = vmax.f32 %v1330_v60, %v1346_v9  ;;  %v1353_v0 = vmax.f32 %v1329_v27, %v1345_v18 }
 0x793   :  { %v1324_v3 = vsel %vm395_vm6, %v2244_v8, %v2245_v46  ;;  %v1323_v4 = vsel %vm395_vm6, %v2195_v48, %v2244_v8  ;;  %v1370_v15 = vsel %vm445_vm7, %v2239_v54, %v2240_v62  ;;  %vm3173_vm6 = vcmask 1044480  }
 0x794   :  { %v2248_v5 = vpop.permute.xlu1 %2247  ;;  %v2253_v21 = vpop.permute.xlu0 %2252  ;;  %v1332_v63 = vmax.f32 %v1306_v13, %v1324_v3  ;;  %v1331_v42 = vmax.f32 %v1305_v2, %v1323_v4  ;;  %v1378_v37 = vmax.f32 %v1354_v28, %v1370_v15 }
 0x795   :  { %v2250_v23 = vunpack.i.h.bf16 %v2248_v5  ;;  %v2249_v10 = vunpack.i.l.bf16 %v2248_v5  ;;  %v2255_v51 = vunpack.i.h.bf16 %v2253_v21  ;;  %v2254_v11 = vunpack.i.l.bf16 %v2253_v21 }
 0x797   :  { %v1347_v30 = vsel %vm420_vm15, %v2200_v39, %v2249_v10  ;;  %v1348_v31 = vsel %vm420_vm15, %v2249_v10, %v2250_v23  ;;  %v1372_v19 = vsel %vm445_vm7, %v2254_v11, %v2255_v51  ;;  %vm3170_vm15 = vmmov %vm3167_vm13 }
 0x798   :  { %v1356_v32 = vmax.f32 %v1332_v63, %v1348_v31  ;;  %v2258_v38 = vpop.permute.xlu1 %2257  ;;  %v1355_v53 = vmax.f32 %v1331_v42, %v1347_v30 }
 0x799   :  { %v2260_v41 = vunpack.i.h.bf16 %v2258_v38  ;;  %v2259_v49 = vunpack.i.l.bf16 %v2258_v38 }
 0x79a   :  { %v1380_v59 = vmax.f32 %v1356_v32, %v1372_v19 }
 0x79b   :  { %v1369_v25 = vsel %vm445_vm7, %v2259_v49, %v2239_v54  ;;  %v1371_v34 = vsel %vm445_vm7, %v2260_v41, %v2254_v11 }
 0x79c   :  { %v1377_v39 = vmax.f32 %v1353_v0, %v1369_v25  ;;  %v1379_v6 = vmax.f32 %v1355_v53, %v1371_v34  ;;  %v1382_v46 = vpack.c.bf16 %v1380_v59, %v1378_v37 }
 0x79e   :  { %1847 = vmatprep.mubr.msk.bf16.mxu1 %vm547_vm8, %v1382_v46  ;;  %v1381_v8 = vpack.c.bf16 %v1379_v6, %v1377_v39  ;;  %vm3174_vm8 = vcmask 130048  }
 0x79f   :  { %vm3175_vm0 = vmmov %vm3174_vm8 }
 0x7a0   :  { %1419 = vmatmul.mubr.bf16.vlgmr.msra.gmra.mrb[20].mxu1 %v1381_v8 }
 0x7a1   :  { %1955 = vmatpush3.bf16.msra.mxu1 %v2899_v17 }
 0x7a2   :  { %1956 = vmatprep.subr.bf16.mxu1 %v2908_v20 }
 0x7a5   :  { %1957 = vmatpush3.bf16.msra.mxu1 %v2908_v20 }
 0x7a6   :  { %1962 = vmatprep.subr.bf16.mxu1 %v2407_v1 }
 0x873   :  { %v1420_v57 = vpop.f32.mrb[20].mxu1 }
 0x874   :  { %v1422_v35 = vpop.f32.mrb[21].mxu1  ;;  %v1438_v55 = vrot.slane %v1420_v57, 4  ;;  %v1429_v60 = vrot.slane %v1420_v57, 6  ;;  %v1447_v52 = vrot.slane %v1420_v57, 2 }
 0x875   :  { %v1423_v48 = vpop.f32.mrb[22].mxu1 }
 0x876   :  { %v1425_v62 = vpop.f32.mrb[23].mxu1  ;;  %v1439_v54 = vrot.slane %v1423_v48, 4  ;;  %v1430_v3 = vrot.slane %v1423_v48, 6  ;;  %v2276_v33 = vpack.i.bf16 %v1423_v48, %v1420_v57  ;;  %v1448_v13 = vrot.slane %v1423_v48, 2 }
 0x878   :  { %v1440_v9 = vsel %vm610_vm9, %v1438_v55, %v1439_v54  ;;  %v1431_v17 = vsel %vm3166_vm12, %v1429_v60, %v1430_v3  ;;  %v1449_v4 = vsel %vm3167_vm13, %v1447_v52, %v1448_v13 }
 0x879   :  { %v2266_v20 = vpack.i.bf16 %v1440_v9, %v1438_v55  ;;  %v2261_v5 = vpack.i.bf16 %v1431_v17, %v1429_v60  ;;  %v2271_v21 = vpack.i.bf16 %v1449_v4, %v1447_v52 }
 0x87b   :  { %2267 = vrot.lane.b32.xlu1 %v2266_v20, %s2411_s20  ;;  %2262 = vrot.lane.b32.xlu0 %v2261_v5, %s2412_s21 }
 0x87f   :  { %2277 = vrot.lane.b32.xlu1 %v2276_v33, %s2419_s9  ;;  %2272 = vrot.lane.b32.xlu0 %v2271_v21, %s2420_s11 }
 0x883   :  { %2287 = vrot.lane.b32.xlu1 %v2266_v20, %s2421_s28  ;;  %2282 = vrot.lane.b32.xlu0 %v2261_v5, %s2422_s30 }
 0x887   :  { %2297 = vrot.lane.b32.xlu1 %v2276_v33, %s2423_s13  ;;  %2292 = vrot.lane.b32.xlu0 %v2271_v21, %s3168_s0 }
 0x8ed   :  { %v2268_v23 = vpop.permute.xlu1 %2267  ;;  %v2263_v10 = vpop.permute.xlu0 %2262 }
 0x8ee   :  { %v2264_v51 = vunpack.i.l.bf16 %v2263_v10  ;;  %v2269_v11 = vunpack.i.l.bf16 %v2268_v23  ;;  %v2265_v2 = vunpack.i.h.bf16 %v2263_v10  ;;  %v2270_v15 = vunpack.i.h.bf16 %v2268_v23 }
 0x8f0   :  { %v1486_v27 = vsel %vm3169_vm14, %v1423_v48, %v2264_v51  ;;  %v1487_v31 = vsel %vm610_vm9, %v2265_v2, %v2269_v11  ;;  %vm3176_vm14 = vcmask 138240  }
 0x8f1   :  { %v1492_v28 = vpack.c.bf16 %v1486_v27, %v1420_v57  ;;  %v2278_v63 = vpop.permute.xlu1 %2277  ;;  %v2273_v29 = vpop.permute.xlu0 %2272 }
 0x8f2   :  { %v2274_v30 = vunpack.i.l.bf16 %v2273_v29  ;;  %v2279_v32 = vunpack.i.l.bf16 %v2278_v63  ;;  %v2275_v38 = vunpack.i.h.bf16 %v2273_v29  ;;  %v2280_v59 = vunpack.i.h.bf16 %v2278_v63 }
 0x8f3   :  { %1939 = vmatpush3.bf16.msra.mxu0 %v1492_v28 }
 0x8f4   :  { %v1488_v42 = vsel %vm3170_vm15, %v2270_v15, %v2274_v30  ;;  %1940 = vmatprep.subr.bf16.mxu0 %v2407_v1  ;;  %v1494_v0 = vpack.c.bf16 %v2279_v32, %v2275_v38 }
 0x8f5   :  { %v1493_v18 = vpack.c.bf16 %v1488_v42, %v1487_v31  ;;  %v2288_v19 = vpop.permute.xlu1 %2287  ;;  %v2283_v41 = vpop.permute.xlu0 %2282 }
 0x8f6   :  { %v2289_v49 = vunpack.i.l.bf16 %v2288_v19  ;;  %v2285_v37 = vunpack.i.h.bf16 %v2283_v41  ;;  %v2284_v53 = vunpack.i.l.bf16 %v2283_v41  ;;  %v2290_v8 = vunpack.i.h.bf16 %v2288_v19 }
 0x8f7   :  { %1941 = vmatpush3.bf16.msra.mxu0 %v1493_v18 }
 0x8f8   :  { %1942 = vmatprep.subr.bf16.mxu0 %v2407_v1  ;;  %v1490_v34 = vsel %vm610_vm9, %v2285_v37, %v2289_v49  ;;  %v1489_v39 = vsel %vm3171_vm4, %v2280_v59, %v2284_v53 }
 0x8f9   :  { %v2293_v25 = vpop.permute.xlu0 %2292  ;;  %v2298_v46 = vpop.permute.xlu1 %2297  ;;  %v1495_v57 = vpack.c.bf16 %v1490_v34, %v1489_v39 }
 0x8fa   :  { %v2294_v6 = vunpack.i.l.bf16 %v2293_v25  ;;  %v2295_v35 = vunpack.i.h.bf16 %v2293_v25  ;;  %v2300_v48 = vunpack.i.h.bf16 %v2298_v46  ;;  %v2299_v55 = vunpack.i.l.bf16 %v2298_v46 }
 0x8fb   :  { %1943 = vmatpush3.bf16.msra.mxu0 %v1494_v0 }
 0x8fc   :  { %1944 = vmatprep.subr.bf16.mxu0 %v2407_v1  ;;  %v1491_v60 = vsel %vm3172_vm5, %v2290_v8, %v2294_v6  ;;  %v1497_v62 = vpack.c.bf16 %v2300_v48, %v2299_v55  ;;  %vm3177_vm5 = vmmov %vm3176_vm14 }
 0x8fd   :  { %v1496_v52 = vpack.c.bf16 %v2295_v35, %v1491_v60 }
 0x8fe   :  { %v1499_v54 = vsel %vm3173_vm6, %v1497_v62, 0 }
 0x8ff   :  { %1945 = vmatpush3.bf16.msra.mxu0 %v1495_v57 }
 0x900   :  { %1946 = vmatprep.subr.bf16.mxu0 %v2407_v1 }
 0x903   :  { %1947 = vmatpush3.bf16.msra.mxu0 %v1496_v52 }
 0x904   :  { %1948 = vmatprep.subr.bf16.mxu0 %v2407_v1 }
 0x907   :  { %1949 = vmatpush3.bf16.msra.mxu0 %v1499_v54 }
 0x908   :  { %1607 = vmatprep.subr.bf16.mxu0 %v2410_v12 }
 0x90a   :  { %1951 = vmatmul.mubr.msk.bf16.vlgmr.msra.gmra.mrb[20].mxu0 %vm445_vm7, %v2775_v14  ;;  %vm1062_vm7 = vcmask 71680  }
 0x90b   :  { %1849 = vmatprep.mubr.msk.bf16.mxu0 %vm3174_vm8, %v2814_v7 }
 0x9dd   :  { %v1535_v3 = vpop.f32.mrb[20].mxu0 }
 0x9de   :  { %v1536_v33 = vadd.f32 %v1535_v3, %v2780_v16  ;;  %v1952_v13 = vpop.f32.mrb[21].mxu0  ;;  %v74_v16 = vld [vmem:[%s3154_s8 + $0x8] sm:$0x7f] }
 0x9df   :  { %v1538_v9 = vpop.f32.mrb[22].mxu0 }
 0x9e0   :  { %v1544_v17 = vmul.f32 %v1536_v33, %v2782_v22  ;;  %v1539_v4 = vadd.f32 %v1538_v9, %v2785_v45  ;;  %v1953_v20 = vpop.f32.mrb[23].mxu0  ;;  %vm1542_vm9 = vcmp.ge.f32.partialorder %v1536_v33, 0.0 }
 0x9e2   :  { %vm1543_vm11 = vcmp.ge.f32.partialorder %v1539_v4, 0.0  ;;  %v1545_v5 = vmul.f32 %v1539_v4, %v2782_v22  ;;  %v1546_v21 = vsel %vm1542_vm9, %v1536_v33, %v1544_v17  ;;  %v73_v22 = vld [vmem:[%s3154_s8] sm:$0xff] }
 0x9e4   :  { %v1547_v23 = vsel %vm1543_vm11, %v1539_v4, %v1545_v5 }
 0x9e5   :  { %v2306_v14 = vpack.i.bf16 %v1547_v23, %v1546_v21  ;;  %v1598_v10 = vpack.c.bf16 %v1547_v23, %v1546_v21 }
 0x9e7   :  { %2307 = vrot.lane.b32.xlu1 %v2306_v14, %s2411_s20  ;;  %2302 = vrot.lane.b32.xlu0 %v2306_v14, %s2412_s21 }
 0x9e8   :  { %1608 = vmatpush1.bf16.msra.mxu0 %v1598_v10 }
 0x9e9   :  { %1609 = vmatprep.subr.bf16.mxu0 %v2410_v12 }
 0x9eb   :  { %2317 = vrot.lane.b32.xlu1 %v2306_v14, %s2419_s9  ;;  %2312 = vrot.lane.b32.xlu0 %v2306_v14, %s2420_s11 }
 0x9ef   :  { %2327 = vrot.lane.b32.xlu1 %v2306_v14, %s2421_s28  ;;  %2322 = vrot.lane.b32.xlu0 %v2306_v14, %s2422_s30 }
 0x9f3   :  { %2337 = vrot.lane.b32.xlu1 %v2306_v14, %s2423_s13  ;;  %2332 = vrot.lane.b32.xlu0 %v2306_v14, %s3168_s0 }
 0x9f7   :  { %988 = vperm.xlu1 %2125, %v74_v16   ;;  %983 = vperm.xlu0 %1989, %v73_v22  }
 0xa59   :  { %v2308_v45 = vpop.permute.xlu1 %2307  ;;  %v2303_v7 = vpop.permute.xlu0 %2302 }
 0xa5a   :  { %v2305_v51 = vunpack.i.h.bf16 %v2303_v7  ;;  %v2304_v11 = vunpack.i.l.bf16 %v2303_v7  ;;  %v2310_v2 = vunpack.i.h.bf16 %v2308_v45  ;;  %v2309_v27 = vunpack.i.l.bf16 %v2308_v45 }
 0xa5c   :  { %v1599_v28 = vpack.c.bf16 %v2305_v51, %v2304_v11  ;;  %v1600_v29 = vpack.c.bf16 %v2310_v2, %v2309_v27 }
 0xa5d   :  { %v2313_v63 = vpop.permute.xlu0 %2312  ;;  %v2318_v31 = vpop.permute.xlu1 %2317 }
 0xa5e   :  { %1610 = vmatpush1.bf16.msra.mxu0 %v1599_v28  ;;  %v2315_v15 = vunpack.i.h.bf16 %v2313_v63  ;;  %v2314_v30 = vunpack.i.l.bf16 %v2313_v63  ;;  %v2320_v42 = vunpack.i.h.bf16 %v2318_v31  ;;  %v2319_v32 = vunpack.i.l.bf16 %v2318_v31 }
 0xa5f   :  { %1611 = vmatprep.subr.bf16.mxu0 %v2410_v12 }
 0xa60   :  { %v1601_v38 = vpack.c.bf16 %v2315_v15, %v2314_v30  ;;  %v1602_v19 = vpack.c.bf16 %v2320_v42, %v2319_v32 }
 0xa61   :  { %v2323_v18 = vpop.permute.xlu0 %2322  ;;  %v2328_v37 = vpop.permute.xlu1 %2327 }
 0xa62   :  { %1612 = vmatpush1.bf16.msra.mxu0 %v1600_v29  ;;  %v2325_v41 = vunpack.i.h.bf16 %v2323_v18  ;;  %v2324_v49 = vunpack.i.l.bf16 %v2323_v18  ;;  %v2330_v53 = vunpack.i.h.bf16 %v2328_v37  ;;  %v2329_v59 = vunpack.i.l.bf16 %v2328_v37 }
 0xa63   :  { %1613 = vmatprep.subr.bf16.mxu0 %v2410_v12 }
 0xa64   :  { %v1603_v0 = vpack.c.bf16 %v2325_v41, %v2324_v49  ;;  %v1604_v34 = vpack.c.bf16 %v2330_v53, %v2329_v59 }
 0xa65   :  { %v2333_v25 = vpop.permute.xlu0 %2332  ;;  %v2338_v46 = vpop.permute.xlu1 %2337 }
 0xa66   :  { %1614 = vmatpush1.bf16.msra.mxu0 %v1601_v38  ;;  %v2335_v39 = vunpack.i.h.bf16 %v2333_v25  ;;  %v2334_v6 = vunpack.i.l.bf16 %v2333_v25  ;;  %v2340_v8 = vunpack.i.h.bf16 %v2338_v46  ;;  %v2339_v57 = vunpack.i.l.bf16 %v2338_v46 }
 0xa67   :  { %1615 = vmatprep.subr.bf16.mxu0 %v2410_v12 }
 0xa68   :  { %v1605_v35 = vpack.c.bf16 %v2335_v39, %v2334_v6  ;;  %v1606_v62 = vpack.c.bf16 %v2340_v8, %v2339_v57 }
 0xa6a   :  { %1616 = vmatpush1.bf16.msra.mxu0 %v1602_v19 }
 0xa6b   :  { %1617 = vmatprep.subr.bf16.mxu0 %v2410_v12 }
 0xa6e   :  { %1618 = vmatpush1.bf16.msra.mxu0 %v1603_v0 }
 0xa6f   :  { %1619 = vmatprep.subr.bf16.mxu0 %v2410_v12 }
 0xa72   :  { %1620 = vmatpush1.bf16.msra.mxu0 %v1604_v34 }
 0xa73   :  { %1621 = vmatprep.subr.bf16.mxu0 %v2410_v12 }
 0xa76   :  { %v3098_v48 = vpop.permute.xlu1 %988  ;;  %v3100_v55 = vpop.permute.xlu0 %983  ;;  %1622 = vmatpush1.bf16.msra.mxu0 %v1605_v35 }
 0xa77   :  { %v1038_v60 = vadd.f32 %v2995_v47, %v3098_v48  ;;  %v1035_v52 = vadd.f32 %v2993_v26, %v3100_v55  ;;  %1623 = vmatprep.subr.bf16.mxu0 %v2410_v12  ;;  %v1041_v12 = vlaneseq }
 0xa79   :  { %1063 = vst.msk [vmem:[%s3158_s12 + $0x8] sm:$0x7f] %vm1062_vm7, %v1038_v60  ;;  %v1046_v54 = vsub.f32 0.0, %v1035_v52  ;;  %v1042_v33 = vshrl.u32 %v1041_v12, 7 }
 0xa7a   :  { %1624 = vmatpush1.bf16.msra.mxu0 %v1606_v62 }
 0xa7b   :  { %v1048_v3 = vmul.f32 1.442695, %v1046_v54  ;;  %vm1044_vm10 = vcmp.eq.s32.totalorder %v1042_v33, 0 }
 0xa7d   :  { %2383 = vpow2.f32 %v1048_v3  ;;  %1640 = vmatmul.mubr.bf16.vlgmr.msra.gmra.mrb[24].mxu0 %v2834_v40 }
 0xa7e   :  { %1850 = vmatprep.mubr.msk.bf16.mxu0 %vm3175_vm0, %v2839_v36 }
 0xa85   :  { %1648 = vmatmul.mubr.bf16.gmra.mrb[28].mxu0 %v2855_v43 }
 0xa87   :  { %v2384_v26 = vpop.eup %2383 }
 0xa88   :  { %v1052_v47 = vadd.f32 1.0, %v2384_v26 }
 0xa8a   :  { %2385 = vrcp.f32 %v1052_v47 }
 0xa94   :  { %v2386_v13 = vpop.eup %2385 }
 0xa95   :  { %v1058_v9 = vsel %vm1044_vm10, %v2386_v13, %v1035_v52 }
 0xa96   :  { %1061 = vst.msk [vmem:[%s3158_s12] sm:$0xff] %vm1060_vm3, %v1058_v9 }
 0xb50   :  { %v1641_v40 = vpop.f32.mrb[24].mxu0 }
 0xb51   :  { %v1642_v36 = vadd.f32 %v1641_v40, %v2913_v24  ;;  %v1643_v17 = vpop.f32.mrb[25].mxu0 }
 0xb52   :  { %v1644_v43 = vpop.f32.mrb[26].mxu0 }
 0xb53   :  { %v1660_v4 = vmul.f32 %v1642_v36, %v2915_v44  ;;  %v1645_v20 = vadd.f32 %v1644_v43, %v2918_v56  ;;  %v1646_v5 = vpop.f32.mrb[27].mxu0  ;;  %vm1656_vm12 = vcmp.ge.f32.partialorder %v1642_v36, 0.0 }
 0xb55   :  { %vm1657_vm13 = vcmp.ge.f32.partialorder %v1645_v20, 0.0  ;;  %v1661_v21 = vmul.f32 %v1645_v20, %v2915_v44  ;;  %v1664_v23 = vsel %vm1656_vm12, %v1642_v36, %v1660_v4 }
 0xb57   :  { %v1665_v14 = vsel %vm1657_vm13, %v1645_v20, %v1661_v21 }
 0xb58   :  { %v1668_v10 = vpack.c.bf16 %v1665_v14, %v1664_v23  ;;  %v1649_v16 = vpop.f32.mrb[28].mxu0 }
 0xb59   :  { %v1650_v22 = vadd.f32 %v1649_v16, %v2923_v50  ;;  %v1651_v45 = vpop.f32.mrb[29].mxu0 }
 0xb5a   :  { %v1652_v7 = vpop.f32.mrb[30].mxu0  ;;  %1958 = vmatprep.mubr.msk.bf16.mxu1 %vm3176_vm14, %v1668_v10 }
 0xb5b   :  { %v1662_v24 = vmul.f32 %v1650_v22, %v2915_v44  ;;  %v1653_v51 = vadd.f32 %v1652_v7, %v2926_v58  ;;  %v1654_v56 = vpop.f32.mrb[31].mxu0  ;;  %vm1658_vm15 = vcmp.ge.f32.partialorder %v1650_v22, 0.0 }
 0xb5d   :  { %vm1659_vm4 = vcmp.ge.f32.partialorder %v1653_v51, 0.0  ;;  %v1663_v11 = vmul.f32 %v1653_v51, %v2915_v44  ;;  %v1666_v2 = vsel %vm1658_vm15, %v1650_v22, %v1662_v24 }
 0xb5f   :  { %v1667_v27 = vsel %vm1659_vm4, %v1653_v51, %v1663_v11 }
 0xb60   :  { %v1669_v28 = vpack.c.bf16 %v1667_v27, %v1666_v2 }
 0xb62   :  { %1959 = vmatmul.mubr.msk.bf16.vlgmr.msra.gmra.mrb[24].mxu1 %vm3177_vm5, %v1669_v28 }
 0xb63   :  { %1966 = vmatprep.mubr.msk.bf16.mxu1 %vm2409_vm2, %v2407_v1 }
 0xc35   :  { %v1960_v50 = vpop.f32.mrb[24].mxu1 }
 0xc36   :  { %v1710_v63 = vpop.f32.mrb[25].mxu1 }
 0xc37   :  { %v1961_v29 = vpop.f32.mrb[26].mxu1 }
 0xc38   :  { %v1726_v15 = vpack.c.bf16 %v1961_v29, %v1960_v50  ;;  %v1713_v30 = vpop.f32.mrb[27].mxu1 }
 0xc39   :  { %v1725_v31 = vpack.c.bf16 %v1713_v30, %v1710_v63 }
 0xc3b   :  { %1963 = vmatpush3.bf16.msra.mxu1 %v1725_v31 }
 0xc3c   :  { %1964 = vmatprep.subr.bf16.mxu1 %v2407_v1 }
 0xc3f   :  { %1965 = vmatpush3.bf16.msra.mxu1 %v1726_v15 }
 0xc42   :  { %1967 = vmatmul.mubr.msk.bf16.vlgmr.msra.gmra.mrb[28].mxu1 %vm996_vm1, %v2973_v61 }
 0xd15   :  { %v1761_v44 = vpop.f32.mrb[28].mxu1 }
 0xd16   :  { %v1762_v58 = vadd.f32 %v1761_v44, %v3100_v55  ;;  %v1968_v42 = vpop.f32.mrb[29].mxu1 }
 0xd17   :  { %v1764_v32 = vpop.f32.mrb[30].mxu1 }
 0xd18   :  { %v1768_v38 = vsub.f32 0.0, %v1762_v58  ;;  %v1765_v18 = vadd.f32 %v1764_v32, %v3098_v48  ;;  %v1969_v19 = vpop.f32.mrb[31].mxu1 }
 0xd1a   :  { %v1770_v41 = vmul.f32 1.442695, %v1768_v38  ;;  %1855 = vst.msk [vmem:[%s3158_s12 + $0x18] sm:$0x7f] %vm1062_vm7, %v1765_v18 }
 0xd1c   :  { %2387 = vpow2.f32 %v1770_v41 }
 0xd26   :  { %v2388_v1 = vpop.eup %2387 }
 0xd27   :  { %v1774_v49 = vadd.f32 1.0, %v2388_v1 }
 0xd29   :  { %2389 = vrcp.f32 %v1774_v49 }
 0xd33   :  { %v2390_v61 = vpop.eup %2389 }
 0xd34   :  { %v1780_v37 = vsel %vm1044_vm10, %v2390_v61, %v1762_v58 }
 0xd35   :  { %1854 = vst.msk [vmem:[%s3158_s12 + $0x10] sm:$0xff] %vm1060_vm3, %v1780_v37 }
 0xd36   :  { %1789 = vsyncpa [#allocation3], 1 }

</bundles_post_ra>
